<compile_context>
chip_gen: v7x
topology: tpu7x:2x2x1
jax: 0.10.0
libtpu: 0.0.40
codegen_flags: <defaults>
</compile_context>

<pallas_src>
import functools
import jax
import jax.numpy as jnp
from jax.experimental import pallas as pl
from jax.experimental.pallas import tpu as pltpu


def _round_up(x, m):
    return (x + m - 1) // m * m


def _mlp_kernel(x_ref, w1_ref, b1_ref, w2_ref, b2_ref, w3_ref, b3_ref, o_ref):
    # Layer 1: Linear + ReLU  (bf16 operands, f32 accumulation)
    h1 = jnp.dot(x_ref[...], w1_ref[...], preferred_element_type=jnp.float32)
    h1 = jnp.maximum(h1 + b1_ref[...], 0.0)
    # Layer 2: Linear + ReLU
    h2 = jnp.dot(h1.astype(jnp.bfloat16), w2_ref[...],
                 preferred_element_type=jnp.float32)
    h2 = jnp.maximum(h2 + b2_ref[...], 0.0)
    # Layer 3: Linear.  Padded class lanes carry bias = -1e30 (and zero weight
    # columns), so they vanish in the softmax without any in-kernel masking.
    logits = jnp.dot(h2.astype(jnp.bfloat16), w3_ref[...],
                     preferred_element_type=jnp.float32) + b3_ref[...]
    # Numerically-stable softmax over the class (last) dim.
    m = jnp.max(logits, axis=-1, keepdims=True)
    e = jnp.exp(logits - m)
    denom = jnp.sum(e, axis=-1, keepdims=True)
    o_ref[...] = (e * pl.reciprocal(denom, approx=True)).astype(o_ref.dtype)


@functools.partial(jax.jit, static_argnames=("block_m",))
def mlp_forward(x, w1, b1, w2, b2, w3, b3, *, block_m=256):
    B, D_in = x.shape
    H1 = w1.shape[1]
    H2 = w2.shape[1]
    C = w3.shape[1]

    # --- lane-dense padding of every non-batch dim to a multiple of 128 ---
    D_pad = _round_up(D_in, 128)
    H1_pad = _round_up(H1, 128)
    H2_pad = _round_up(H2, 128)
    C_pad = _round_up(C, 128)

    xp = jnp.pad(x, ((0, 0), (0, D_pad - D_in)))
    w1p = jnp.pad(w1, ((0, D_pad - D_in), (0, H1_pad - H1)))
    b1p = jnp.pad(b1, ((0, 0), (0, H1_pad - H1)))
    w2p = jnp.pad(w2, ((0, H1_pad - H1), (0, H2_pad - H2)))
    b2p = jnp.pad(b2, ((0, 0), (0, H2_pad - H2)))
    w3p = jnp.pad(w3, ((0, H2_pad - H2), (0, C_pad - C)))
    # Padded class lanes get bias -1e30 -> exp underflows to 0 in the softmax.
    b3p = jnp.pad(b3, ((0, 0), (0, C_pad - C)), constant_values=-1e30)

    # bf16 MXU feed (f32 accumulation happens in-kernel); biases stay f32.
    xp = xp.astype(jnp.bfloat16)
    w1p = w1p.astype(jnp.bfloat16)
    w2p = w2p.astype(jnp.bfloat16)
    w3p = w3p.astype(jnp.bfloat16)

    # --- batch tiling: pad batch to a tile multiple ---
    bm = min(block_m, _round_up(B, 8))
    B_pad = _round_up(B, bm)
    if B_pad != B:
        xp = jnp.pad(xp, ((0, B_pad - B), (0, 0)))

    grid = (B_pad // bm,)

    out = pl.pallas_call(
        _mlp_kernel,
        out_shape=jax.ShapeDtypeStruct((B_pad, C_pad), jnp.float32),
        grid_spec=pltpu.PrefetchScalarGridSpec(
            num_scalar_prefetch=0,
            grid=grid,
            in_specs=[
                pl.BlockSpec((bm, D_pad), lambda i: (i, 0)),     # x row-tile (bf16)
                pl.BlockSpec((D_pad, H1_pad), lambda i: (0, 0)),  # w1 (resident)
                pl.BlockSpec((1, H1_pad), lambda i: (0, 0)),      # b1
                pl.BlockSpec((H1_pad, H2_pad), lambda i: (0, 0)),  # w2
                pl.BlockSpec((1, H2_pad), lambda i: (0, 0)),      # b2
                pl.BlockSpec((H2_pad, C_pad), lambda i: (0, 0)),   # w3 (lane-padded)
                pl.BlockSpec((1, C_pad), lambda i: (0, 0)),        # b3 (-1e30 padded)
            ],
            out_specs=pl.BlockSpec((bm, C_pad), lambda i: (i, 0)),
        ),
        compiler_params=pltpu.CompilerParams(
            dimension_semantics=("parallel",),
        ),
    )(xp, w1p, b1p, w2p, b2p, w3p, b3p)

    # Drop batch padding and padded class lanes.
    return out[:B, :C]


def _pick_block_m(batch):
    """Generation-aware grid shape: 1 big step on single-TC parts, >=2 steps per
    TensorCore on multi-core parts (e.g. v7x)."""
    try:
        n_tc = int(getattr(jax.devices()[0], "num_cores", 1) or 1)
    except Exception:  # pragma: no cover - conservative fallback
        n_tc = 1
    if n_tc <= 1:
        return max(8, _round_up(batch, 8))          # single grid step
    steps = 2 * n_tc                                 # >=2 steps per TensorCore
    return max(128, _round_up(-(-batch // steps), 128))


def _init_linear(key, fan_in, fan_out):
    # Deterministic torch-like init: U(-1/sqrt(fan_in), 1/sqrt(fan_in)).
    kw, kb = jax.random.split(key)
    bound = 1.0 / jnp.sqrt(jnp.float32(fan_in))
    w = jax.random.uniform(kw, (fan_in, fan_out), jnp.float32, -bound, bound)
    b = jax.random.uniform(kb, (1, fan_out), jnp.float32, -bound, bound)
    return w, b


if __name__ == "__main__":
    # Shapes consistent with the module: hidden1=128, hidden2=64, classes=10.
    batch = 512
    num_inputs = 64
    hidden_size1 = 128
    hidden_size2 = 64
    num_outputs = 10

    key = jax.random.PRNGKey(0)
    kx, k1, k2, k3 = jax.random.split(key, 4)

    x = jax.random.normal(kx, (batch, num_inputs), jnp.float32)
    w1, b1 = _init_linear(k1, num_inputs, hidden_size1)
    w2, b2 = _init_linear(k2, hidden_size1, hidden_size2)
    w3, b3 = _init_linear(k3, hidden_size2, num_outputs)

    block_m = _pick_block_m(batch)
    out = mlp_forward(x, w1, b1, w2, b2, w3, b3, block_m=block_m)
    out = jax.block_until_ready(out)

    # Pure-JAX f32 reference (tolerance accounts for bf16 MXU feed + approx recip).
    h1 = jnp.maximum(x @ w1 + b1, 0.0)
    h2 = jnp.maximum(h1 @ w2 + b2, 0.0)
    ref = jax.nn.softmax(h2 @ w3 + b3, axis=-1)
    assert out.shape == (batch, num_outputs)
    assert jnp.allclose(out, ref, atol=2e-2, rtol=2e-2)
    assert jnp.allclose(jnp.sum(out, axis=-1), 1.0, atol=5e-3)

    print("KERNEL_OK")
</pallas_src>

<mosaic_0001>
module attributes {stable_mosaic.version = 11 : i64} {
  func.func @_mlp_kernel(%arg0: i32, %arg1: memref<512x128xbf16, #tpu.memory_space<vmem>>, %arg2: memref<128x128xbf16, #tpu.memory_space<vmem>>, %arg3: memref<1x128xf32, #tpu.memory_space<vmem>>, %arg4: memref<128x128xbf16, #tpu.memory_space<vmem>>, %arg5: memref<1x128xf32, #tpu.memory_space<vmem>>, %arg6: memref<128x128xbf16, #tpu.memory_space<vmem>>, %arg7: memref<1x128xf32, #tpu.memory_space<vmem>>, %arg8: memref<512x128xf32, #tpu.memory_space<vmem>>) attributes {dimension_semantics = [#tpu.dimension_semantics<parallel>], iteration_bounds = array<i64: 1>, scalar_prefetch = 0 : i64, scratch_operands = 0 : i64, tpu.core_type = #tpu.core_type<tc>, window_params = [{transform_indices = @transform_0, window_bounds = array<i64: 512, 128>}, {pipeline_mode = #tpu.pipeline_mode<synchronous>, transform_indices = @transform_1, window_bounds = array<i64: 128, 128>}, {pipeline_mode = #tpu.pipeline_mode<synchronous>, transform_indices = @transform_2, window_bounds = array<i64: 1, 128>}, {pipeline_mode = #tpu.pipeline_mode<synchronous>, transform_indices = @transform_3, window_bounds = array<i64: 128, 128>}, {pipeline_mode = #tpu.pipeline_mode<synchronous>, transform_indices = @transform_4, window_bounds = array<i64: 1, 128>}, {pipeline_mode = #tpu.pipeline_mode<synchronous>, transform_indices = @transform_5, window_bounds = array<i64: 128, 128>}, {pipeline_mode = #tpu.pipeline_mode<synchronous>, transform_indices = @transform_6, window_bounds = array<i64: 1, 128>}, {transform_indices = @transform_7, window_bounds = array<i64: 512, 128>}]} {
    %c0 = arith.constant 0 : index
    %c0_0 = arith.constant 0 : index
    %0 = vector.load %arg1[%c0, %c0_0] : memref<512x128xbf16, #tpu.memory_space<vmem>>, vector<512x128xbf16>
    %c0_1 = arith.constant 0 : index
    %c0_2 = arith.constant 0 : index
    %1 = vector.load %arg2[%c0_1, %c0_2] : memref<128x128xbf16, #tpu.memory_space<vmem>>, vector<128x128xbf16>
    %cst = arith.constant dense<0.000000e+00> : vector<512x128xf32>
    %2 = tpu.matmul %0, %1, %cst {dimension_numbers = #tpu.dot_dimension_numbers<[1], [0], [0], [1], [0, 0, 1, 1], [], []>} : vector<512x128xbf16>, vector<128x128xbf16>, vector<512x128xf32> -> vector<512x128xf32>
    %c0_3 = arith.constant 0 : index
    %c0_4 = arith.constant 0 : index
    %3 = vector.load %arg3[%c0_3, %c0_4] : memref<1x128xf32, #tpu.memory_space<vmem>>, vector<1x128xf32>
    %4 = vector.broadcast %3 : vector<1x128xf32> to vector<512x128xf32>
    %5 = arith.addf %2, %4 : vector<512x128xf32>
    %cst_5 = arith.constant 0.000000e+00 : f32
    %6 = vector.broadcast %cst_5 : f32 to vector<512x128xf32>
    %7 = arith.maximumf %5, %6 : vector<512x128xf32>
    %8 = arith.truncf %7 : vector<512x128xf32> to vector<512x128xbf16>
    %c0_6 = arith.constant 0 : index
    %c0_7 = arith.constant 0 : index
    %9 = vector.load %arg4[%c0_6, %c0_7] : memref<128x128xbf16, #tpu.memory_space<vmem>>, vector<128x128xbf16>
    %cst_8 = arith.constant dense<0.000000e+00> : vector<512x128xf32>
    %10 = tpu.matmul %8, %9, %cst_8 {dimension_numbers = #tpu.dot_dimension_numbers<[1], [0], [0], [1], [0, 0, 1, 1], [], []>} : vector<512x128xbf16>, vector<128x128xbf16>, vector<512x128xf32> -> vector<512x128xf32>
    %c0_9 = arith.constant 0 : index
    %c0_10 = arith.constant 0 : index
    %11 = vector.load %arg5[%c0_9, %c0_10] : memref<1x128xf32, #tpu.memory_space<vmem>>, vector<1x128xf32>
    %12 = vector.broadcast %11 : vector<1x128xf32> to vector<512x128xf32>
    %13 = arith.addf %10, %12 : vector<512x128xf32>
    %cst_11 = arith.constant 0.000000e+00 : f32
    %14 = vector.broadcast %cst_11 : f32 to vector<512x128xf32>
    %15 = arith.maximumf %13, %14 : vector<512x128xf32>
    %16 = arith.truncf %15 : vector<512x128xf32> to vector<512x128xbf16>
    %c0_12 = arith.constant 0 : index
    %c0_13 = arith.constant 0 : index
    %17 = vector.load %arg6[%c0_12, %c0_13] : memref<128x128xbf16, #tpu.memory_space<vmem>>, vector<128x128xbf16>
    %cst_14 = arith.constant dense<0.000000e+00> : vector<512x128xf32>
    %18 = tpu.matmul %16, %17, %cst_14 {dimension_numbers = #tpu.dot_dimension_numbers<[1], [0], [0], [1], [0, 0, 1, 1], [], []>} : vector<512x128xbf16>, vector<128x128xbf16>, vector<512x128xf32> -> vector<512x128xf32>
    %c0_15 = arith.constant 0 : index
    %c0_16 = arith.constant 0 : index
    %19 = vector.load %arg7[%c0_15, %c0_16] : memref<1x128xf32, #tpu.memory_space<vmem>>, vector<1x128xf32>
    %20 = vector.broadcast %19 : vector<1x128xf32> to vector<512x128xf32>
    %21 = arith.addf %18, %20 : vector<512x128xf32>
    %cst_17 = arith.constant dense<0xFF800000> : vector<512xf32>
    %22 = vector.multi_reduction <maximumf>, %21, %cst_17 [1] : vector<512x128xf32> to vector<512xf32>
    %23 = vector.shape_cast %22 : vector<512xf32> to vector<512x1xf32>
    %24 = vector.broadcast %23 : vector<512x1xf32> to vector<512x128xf32>
    %25 = arith.subf %21, %24 : vector<512x128xf32>
    %26 = math.exp %25 : vector<512x128xf32>
    %cst_18 = arith.constant dense<0.000000e+00> : vector<512xf32>
    %27 = vector.multi_reduction <add>, %26, %cst_18 [1] : vector<512x128xf32> to vector<512xf32>
    %28 = vector.shape_cast %27 : vector<512xf32> to vector<512x1xf32>
    %29 = tpu.reciprocal %28 {approx = true} : vector<512x1xf32> -> vector<512x1xf32>
    %30 = vector.broadcast %29 : vector<512x1xf32> to vector<512x128xf32>
    %31 = arith.mulf %26, %30 : vector<512x128xf32>
    %c0_19 = arith.constant 0 : index
    %c0_20 = arith.constant 0 : index
    %32 = vector.load %arg8[%c0_19, %c0_20] : memref<512x128xf32, #tpu.memory_space<vmem>>, vector<512x128xf32>
    tpu.vector_store %arg8[%c0_19, %c0_20], %31 {strides = array<i32>} : memref<512x128xf32, #tpu.memory_space<vmem>>, vector<512x128xf32>,
    return
  }
  func.func @transform_0(%arg0: i32) -> (i32, i32) {
    %c0_i32 = arith.constant 0 : i32
    %c0_i32_0 = arith.constant 0 : i32
    return %arg0, %c0_i32 : i32, i32
  }
  func.func @transform_1(%arg0: i32) -> (i32, i32) {
    %c0_i32 = arith.constant 0 : i32
    %c0_i32_0 = arith.constant 0 : i32
    %c0_i32_1 = arith.constant 0 : i32
    return %c0_i32, %c0_i32_0 : i32, i32
  }
  func.func @transform_2(%arg0: i32) -> (i32, i32) {
    %c0_i32 = arith.constant 0 : i32
    %c0_i32_0 = arith.constant 0 : i32
    %c0_i32_1 = arith.constant 0 : i32
    return %c0_i32, %c0_i32_0 : i32, i32
  }
  func.func @transform_3(%arg0: i32) -> (i32, i32) {
    %c0_i32 = arith.constant 0 : i32
    %c0_i32_0 = arith.constant 0 : i32
    %c0_i32_1 = arith.constant 0 : i32
    return %c0_i32, %c0_i32_0 : i32, i32
  }
  func.func @transform_4(%arg0: i32) -> (i32, i32) {
    %c0_i32 = arith.constant 0 : i32
    %c0_i32_0 = arith.constant 0 : i32
    %c0_i32_1 = arith.constant 0 : i32
    return %c0_i32, %c0_i32_0 : i32, i32
  }
  func.func @transform_5(%arg0: i32) -> (i32, i32) {
    %c0_i32 = arith.constant 0 : i32
    %c0_i32_0 = arith.constant 0 : i32
    %c0_i32_1 = arith.constant 0 : i32
    return %c0_i32, %c0_i32_0 : i32, i32
  }
  func.func @transform_6(%arg0: i32) -> (i32, i32) {
    %c0_i32 = arith.constant 0 : i32
    %c0_i32_0 = arith.constant 0 : i32
    %c0_i32_1 = arith.constant 0 : i32
    return %c0_i32, %c0_i32_0 : i32, i32
  }
  func.func @transform_7(%arg0: i32) -> (i32, i32) {
    %c0_i32 = arith.constant 0 : i32
    %c0_i32_0 = arith.constant 0 : i32
    return %arg0, %c0_i32 : i32, i32
  }
}

</mosaic_0001>

<bundles_post_ra>
// kernel: mlp_forward.1
= control target key start
LH: loop header
LB: loop body
LE: loop exit
PB: predicated region body
PF: predicated region fallthrough
CT: control target
= control target key end

     0   :  { %s4101_s1 = inlined_call_operand.vmem [shape: bf16[128,128], index: 1, kind: input, shape index: {}]   ;;  %s4102_s0 = inlined_call_operand.vmem [shape: bf16[512,128], index: 0, kind: input, shape index: {}]   ;;  %s4103_s3 = inlined_call_operand.vmem [shape: bf16[128,128], index: 3, kind: input, shape index: {}]   ;;  %s4104_s2 = inlined_call_operand.vmem [shape: f32[1,128], index: 2, kind: input, shape index: {}]   ;;  %s4105_s5 = inlined_call_operand.vmem [shape: bf16[128,128], index: 5, kind: input, shape index: {}]   ;;  %s4106_s4 = inlined_call_operand.vmem [shape: f32[1,128], index: 4, kind: input, shape index: {}]   ;;  %s4107_s6 = inlined_call_operand.vmem [shape: f32[1,128], index: 6, kind: input, shape index: {}]   ;;  %s4108_s7 = inlined_call_operand.vmem [shape: f32[512,128], index: 7, kind: output, shape index: {}]  }
   0x1   :  { %v2634_v0 = vld [vmem:[%s4101_s1] sm:$0xff]   ;;  %v2635_v1 = vld [vmem:[%s4101_s1 + $0x8] sm:$0xff]   ;;  %v2636_v2 = vld [vmem:[%s4101_s1 + $0x10] sm:$0xff]  }
   0x2   :  { %2378 = vmatprep.subr.bf16.mxu0 %v2634_v0  ;;  %2618 = vmatprep.subr.bf16.mxu1 %v2634_v0  ;;  %v2637_v3 = vld [vmem:[%s4101_s1 + $0x18] sm:$0xff]   ;;  %v2642_v4 = vld [vmem:[%s4102_s0] sm:$0xff]   ;;  %v2639_v6 = vld [vmem:[%s4101_s1 + $0x28] sm:$0xff]  }
   0x3   :  { %2379 = vmatpush3.bf16.msra.mxu0 %v2634_v0  ;;  %2626 = vmatpush3.bf16.msra.mxu1 %v2634_v0  ;;  %v2638_v5 = vld [vmem:[%s4101_s1 + $0x20] sm:$0xff]   ;;  %v2640_v7 = vld [vmem:[%s4101_s1 + $0x30] sm:$0xff]   ;;  %v2641_v8 = vld [vmem:[%s4101_s1 + $0x38] sm:$0xff]  }
   0x4   :  { %2380 = vmatprep.subr.bf16.mxu0 %v2635_v1  ;;  %2619 = vmatprep.subr.bf16.mxu1 %v2635_v1  ;;  %v2658_v9 = vld [vmem:[%s4102_s0 + $0x80] sm:$0xff]   ;;  %v2643_v10 = vld [vmem:[%s4102_s0 + $0x8] sm:$0xff]   ;;  %v2644_v11 = vld [vmem:[%s4102_s0 + $0x10] sm:$0xff]  }
   0x5   :  { %2394 = vmatprep.mubr.bf16.mxu0 %v2642_v4  ;;  %2426 = vmatprep.mubr.bf16.mxu1 %v2658_v9  ;;  %v2659_v12 = vld [vmem:[%s4102_s0 + $0x88] sm:$0xff]   ;;  %v2660_v13 = vld [vmem:[%s4102_s0 + $0x90] sm:$0xff]   ;;  %v2645_v14 = vld [vmem:[%s4102_s0 + $0x18] sm:$0xff]  }
   0x6   :  { %v2646_v15 = vld [vmem:[%s4102_s0 + $0x20] sm:$0xff]   ;;  %v2661_v16 = vld [vmem:[%s4102_s0 + $0x98] sm:$0xff]   ;;  %v2675_v19 = vld [vmem:[%s4103_s3 + $0x8] sm:$0xff]  }
   0x7   :  { %2381 = vmatpush3.bf16.msra.mxu0 %v2635_v1  ;;  %2627 = vmatpush3.bf16.msra.mxu1 %v2635_v1  ;;  %v2662_v17 = vld [vmem:[%s4102_s0 + $0xa0] sm:$0xff]   ;;  %v2647_v20 = vld [vmem:[%s4102_s0 + $0x28] sm:$0xff]   ;;  %v2648_v21 = vld [vmem:[%s4102_s0 + $0x30] sm:$0xff]  }
   0x8   :  { %2382 = vmatprep.subr.bf16.mxu0 %v2636_v2  ;;  %2620 = vmatprep.subr.bf16.mxu1 %v2636_v2  ;;  %v2674_v18 = vld [vmem:[%s4103_s3] sm:$0xff]   ;;  %v2663_v22 = vld [vmem:[%s4102_s0 + $0xa8] sm:$0xff]   ;;  %v2664_v23 = vld [vmem:[%s4102_s0 + $0xb0] sm:$0xff]  }
   0x9   :  { %v2676_v24 = vld [vmem:[%s4103_s3 + $0x10] sm:$0xff]   ;;  %v2677_v25 = vld [vmem:[%s4103_s3 + $0x18] sm:$0xff]   ;;  %v2650_v28 = vld [vmem:[%s4102_s0 + $0x40] sm:$0xff]  }
   0xa   :  { %v2649_v26 = vld [vmem:[%s4102_s0 + $0x38] sm:$0xff]   ;;  %v2666_v29 = vld [vmem:[%s4102_s0 + $0xc0] sm:$0xff]   ;;  %v2679_v31 = vld [vmem:[%s4103_s3 + $0x28] sm:$0xff]  }
   0xb   :  { %2383 = vmatpush3.bf16.msra.mxu0 %v2636_v2  ;;  %2628 = vmatpush3.bf16.msra.mxu1 %v2636_v2  ;;  %v2665_v27 = vld [vmem:[%s4102_s0 + $0xb8] sm:$0xff]   ;;  %v2678_v30 = vld [vmem:[%s4103_s3 + $0x20] sm:$0xff]   ;;  %v2651_v32 = vld [vmem:[%s4102_s0 + $0x48] sm:$0xff]  }
   0xc   :  { %2384 = vmatprep.subr.bf16.mxu0 %v2637_v3  ;;  %2621 = vmatprep.subr.bf16.mxu1 %v2637_v3  ;;  %v2667_v33 = vld [vmem:[%s4102_s0 + $0xc8] sm:$0xff]   ;;  %v2652_v34 = vld [vmem:[%s4102_s0 + $0x50] sm:$0xff]   ;;  %v2653_v37 = vld [vmem:[%s4102_s0 + $0x58] sm:$0xff]  }
   0xd   :  { %v2668_v35 = vld [vmem:[%s4102_s0 + $0xd0] sm:$0xff]   ;;  %v2669_v38 = vld [vmem:[%s4102_s0 + $0xd8] sm:$0xff]   ;;  %v2654_v39 = vld [vmem:[%s4102_s0 + $0x60] sm:$0xff]  }
   0xe   :  { %v2680_v36 = vld [vmem:[%s4103_s3 + $0x30] sm:$0xff]   ;;  %v2670_v40 = vld [vmem:[%s4102_s0 + $0xe0] sm:$0xff]   ;;  %v2655_v41 = vld [vmem:[%s4102_s0 + $0x68] sm:$0xff]  }
   0xf   :  { %2385 = vmatpush3.bf16.msra.mxu0 %v2637_v3  ;;  %2629 = vmatpush3.bf16.msra.mxu1 %v2637_v3  ;;  %v2671_v42 = vld [vmem:[%s4102_s0 + $0xe8] sm:$0xff]   ;;  %v2656_v43 = vld [vmem:[%s4102_s0 + $0x70] sm:$0xff]   ;;  %v2657_v45 = vld [vmem:[%s4102_s0 + $0x78] sm:$0xff]  }
  0x10   :  { %2386 = vmatprep.subr.bf16.mxu0 %v2638_v5  ;;  %2622 = vmatprep.subr.bf16.mxu1 %v2638_v5  ;;  %v2672_v44 = vld [vmem:[%s4102_s0 + $0xf0] sm:$0xff]   ;;  %v2673_v46 = vld [vmem:[%s4102_s0 + $0xf8] sm:$0xff]   ;;  %v3133_v48 = vld [vmem:[%s4104_s2] ss:$0 sm:$0xff] }
  0x11   :  { %v2681_v47 = vld [vmem:[%s4103_s3 + $0x38] sm:$0xff]  }
  0x13   :  { %2387 = vmatpush3.bf16.msra.mxu0 %v2638_v5  ;;  %2630 = vmatpush3.bf16.msra.mxu1 %v2638_v5 }
  0x14   :  { %2388 = vmatprep.subr.bf16.mxu0 %v2639_v6  ;;  %2623 = vmatprep.subr.bf16.mxu1 %v2639_v6 }
  0x17   :  { %2389 = vmatpush3.bf16.msra.mxu0 %v2639_v6  ;;  %2631 = vmatpush3.bf16.msra.mxu1 %v2639_v6 }
  0x18   :  { %2390 = vmatprep.subr.bf16.mxu0 %v2640_v7  ;;  %2624 = vmatprep.subr.bf16.mxu1 %v2640_v7 }
  0x1b   :  { %2391 = vmatpush3.bf16.msra.mxu0 %v2640_v7  ;;  %2632 = vmatpush3.bf16.msra.mxu1 %v2640_v7  ;;  %v2682_v7 = vld [vmem:[%s4105_s5] sm:$0xff]  }
  0x1c   :  { %2392 = vmatprep.subr.bf16.mxu0 %v2641_v8  ;;  %2625 = vmatprep.subr.bf16.mxu1 %v2641_v8 }
  0x1f   :  { %2393 = vmatpush3.bf16.msra.mxu0 %v2641_v8  ;;  %2633 = vmatpush3.bf16.msra.mxu1 %v2641_v8  ;;  %v2683_v8 = vld [vmem:[%s4105_s5 + $0x8] sm:$0xff]  }
  0x20   :  { %2458 = vmatprep.subr.bf16.mxu1 %v2674_v18  ;;  %2538 = vmatprep.subr.bf16.mxu0 %v2682_v7 }
  0x22   :  { %2395 = vmatmul.mubr.bf16.vlgmr.msra.gmra.mrb[0].mxu0 %v2643_v10  ;;  %2427 = vmatmul.mubr.bf16.vlgmr.msra.gmra.mrb[0].mxu1 %v2659_v12 }
  0x23   :  { %2398 = vmatprep.mubr.bf16.mxu0 %v2644_v11  ;;  %2430 = vmatprep.mubr.bf16.mxu1 %v2660_v13 }
  0x24   :  { %2459 = vmatpush3.bf16.msra.mxu1 %v2674_v18  ;;  %2539 = vmatpush3.bf16.msra.mxu0 %v2682_v7 }
  0x25   :  { %2460 = vmatprep.subr.bf16.mxu1 %v2675_v19  ;;  %2540 = vmatprep.subr.bf16.mxu0 %v2683_v8 }
  0x28   :  { %2461 = vmatpush3.bf16.msra.mxu1 %v2675_v19  ;;  %2541 = vmatpush3.bf16.msra.mxu0 %v2683_v8 }
  0x29   :  { %2462 = vmatprep.subr.bf16.mxu1 %v2676_v24 }
  0x2a   :  { %2399 = vmatmul.mubr.bf16.gmra.mrb[4].mxu0 %v2645_v14  ;;  %2431 = vmatmul.mubr.bf16.gmra.mrb[4].mxu1 %v2661_v16 }
  0x2b   :  { %2402 = vmatprep.mubr.bf16.mxu0 %v2646_v15  ;;  %2434 = vmatprep.mubr.bf16.mxu1 %v2662_v17  ;;  %v2684_v17 = vld [vmem:[%s4105_s5 + $0x10] sm:$0xff]  }
  0x2c   :  { %2463 = vmatpush3.bf16.msra.mxu1 %v2676_v24  ;;  %2542 = vmatprep.subr.bf16.mxu0 %v2684_v17 }
  0x2d   :  { %2464 = vmatprep.subr.bf16.mxu1 %v2677_v25  ;;  %2543 = vmatpush3.bf16.msra.mxu0 %v2684_v17 }
  0x30   :  { %2465 = vmatpush3.bf16.msra.mxu1 %v2677_v25 }
  0x31   :  { %2466 = vmatprep.subr.bf16.mxu1 %v2678_v30 }
  0x32   :  { %2403 = vmatmul.mubr.bf16.gmra.mrb[8].mxu0 %v2647_v20  ;;  %2435 = vmatmul.mubr.bf16.gmra.mrb[8].mxu1 %v2663_v22 }
  0x33   :  { %2406 = vmatprep.mubr.bf16.mxu0 %v2648_v21  ;;  %2438 = vmatprep.mubr.bf16.mxu1 %v2664_v23 }
  0x34   :  { %2467 = vmatpush3.bf16.msra.mxu1 %v2678_v30 }
  0x35   :  { %2468 = vmatprep.subr.bf16.mxu1 %v2679_v31 }
  0x38   :  { %2469 = vmatpush3.bf16.msra.mxu1 %v2679_v31  ;;  %v2685_v31 = vld [vmem:[%s4105_s5 + $0x18] sm:$0xff]  }
  0x39   :  { %2470 = vmatprep.subr.bf16.mxu1 %v2680_v36  ;;  %2544 = vmatprep.subr.bf16.mxu0 %v2685_v31 }
  0x3a   :  { %2407 = vmatmul.mubr.bf16.gmra.mrb[12].mxu0 %v2649_v26  ;;  %2439 = vmatmul.mubr.bf16.gmra.mrb[12].mxu1 %v2665_v27 }
  0x3b   :  { %2410 = vmatprep.mubr.bf16.mxu0 %v2650_v28  ;;  %2442 = vmatprep.mubr.bf16.mxu1 %v2666_v29 }
  0x3c   :  { %2471 = vmatpush3.bf16.msra.mxu1 %v2680_v36  ;;  %2545 = vmatpush3.bf16.msra.mxu0 %v2685_v31 }
  0x3d   :  { %2472 = vmatprep.subr.bf16.mxu1 %v2681_v47 }
  0x40   :  { %2473 = vmatpush3.bf16.msra.mxu1 %v2681_v47 }
  0x42   :  { %2411 = vmatmul.mubr.bf16.gmra.mrb[16].mxu0 %v2651_v32  ;;  %2443 = vmatmul.mubr.bf16.gmra.mrb[16].mxu1 %v2667_v33 }
  0x43   :  { %2414 = vmatprep.mubr.bf16.mxu0 %v2652_v34  ;;  %2446 = vmatprep.mubr.bf16.mxu1 %v2668_v35 }
  0x4a   :  { %2415 = vmatmul.mubr.bf16.gmra.mrb[20].mxu0 %v2653_v37  ;;  %2447 = vmatmul.mubr.bf16.gmra.mrb[20].mxu1 %v2669_v38 }
  0x4b   :  { %2418 = vmatprep.mubr.bf16.mxu0 %v2654_v39  ;;  %2450 = vmatprep.mubr.bf16.mxu1 %v2670_v40 }
  0x52   :  { %2419 = vmatmul.mubr.bf16.gmra.mrb[24].mxu0 %v2655_v41  ;;  %2451 = vmatmul.mubr.bf16.gmra.mrb[24].mxu1 %v2671_v42 }
  0x53   :  { %2422 = vmatprep.mubr.bf16.mxu0 %v2656_v43  ;;  %2454 = vmatprep.mubr.bf16.mxu1 %v2672_v44 }
  0x5a   :  { %2423 = vmatmul.mubr.bf16.gmra.mrb[28].mxu0 %v2657_v45  ;;  %2455 = vmatmul.mubr.bf16.gmra.mrb[28].mxu1 %v2673_v46 }
  0xf5   :  { %v2396_v49 = vpop.f32.mrb[0].mxu0  ;;  %v2428_v50 = vpop.f32.mrb[0].mxu1 }
  0xf6   :  { %v397_v51 = vadd.f32 %v2396_v49, %v3133_v48  ;;  %v388_v52 = vpop.f32.mrb[1].mxu0  ;;  %v525_v53 = vadd.f32 %v2428_v50, %v3133_v48  ;;  %v516_v54 = vpop.f32.mrb[1].mxu1 }
  0xf7   :  { %v389_v55 = vadd.f32 %v3133_v48, %v388_v52  ;;  %v2397_v56 = vpop.f32.mrb[2].mxu0  ;;  %v517_v57 = vadd.f32 %v3133_v48, %v516_v54  ;;  %v2429_v58 = vpop.f32.mrb[2].mxu1  ;;  %v2686_v52 = vld [vmem:[%s4105_s5 + $0x20] sm:$0xff]  }
  0xf8   :  { %v645_v59 = vmax.f32 %v397_v51, 0.0  ;;  %v400_v60 = vadd.f32 %v2397_v56, %v3133_v48  ;;  %v391_v61 = vpop.f32.mrb[3].mxu0  ;;  %v677_v62 = vmax.f32 %v525_v53, 0.0  ;;  %v528_v63 = vadd.f32 %v2429_v58, %v3133_v48  ;;  %v519_v0 = vpop.f32.mrb[3].mxu1  ;;  %2546 = vmatprep.subr.bf16.mxu0 %v2686_v52 }
  0xf9   :  { %v643_v1 = vmax.f32 %v389_v55, 0.0  ;;  %v392_v2 = vadd.f32 %v3133_v48, %v391_v61  ;;  %v675_v3 = vmax.f32 %v517_v57, 0.0  ;;  %v520_v4 = vadd.f32 %v3133_v48, %v519_v0  ;;  %2547 = vmatpush3.bf16.msra.mxu0 %v2686_v52 }
  0xfa   :  { %v646_v5 = vmax.f32 %v400_v60, 0.0  ;;  %v678_v6 = vmax.f32 %v528_v63, 0.0 }
  0xfb   :  { %v644_v9 = vmax.f32 %v392_v2, 0.0  ;;  %v676_v10 = vmax.f32 %v520_v4, 0.0  ;;  %v2687_v4 = vld [vmem:[%s4105_s5 + $0x28] sm:$0xff]  }
  0xfc   :  { %v708_v11 = vpack.c.bf16 %v646_v5, %v645_v59  ;;  %v3149_v12 = vpack.c.bf16 %v678_v6, %v677_v62  ;;  %2548 = vmatprep.subr.bf16.mxu0 %v2687_v4 }
  0xfd   :  { %v707_v13 = vpack.c.bf16 %v644_v9, %v643_v1  ;;  %v2400_v14 = vpop.f32.mrb[4].mxu0  ;;  %v3151_v15 = vpack.c.bf16 %v676_v10, %v675_v3  ;;  %v2432_v16 = vpop.f32.mrb[4].mxu1  ;;  %2549 = vmatpush3.bf16.msra.mxu0 %v2687_v4 }
  0xfe   :  { %v413_v18 = vadd.f32 %v2400_v14, %v3133_v48  ;;  %v404_v19 = vpop.f32.mrb[5].mxu0  ;;  %v541_v20 = vadd.f32 %v2432_v16, %v3133_v48  ;;  %v532_v21 = vpop.f32.mrb[5].mxu1 }
  0xff   :  { %v405_v22 = vadd.f32 %v3133_v48, %v404_v19  ;;  %v2401_v23 = vpop.f32.mrb[6].mxu0  ;;  %2474 = vmatprep.mubr.bf16.mxu1 %v707_v13  ;;  %v533_v24 = vadd.f32 %v3133_v48, %v532_v21  ;;  %v2433_v25 = vpop.f32.mrb[6].mxu1 }
 0x100   :  { %v416_v26 = vadd.f32 %v2401_v23, %v3133_v48  ;;  %v407_v27 = vpop.f32.mrb[7].mxu0  ;;  %2475 = vmatmul.mubr.bf16.vlgmr.msra.gmra.mrb[32].mxu1 %v708_v11  ;;  %v681_v28 = vmax.f32 %v541_v20, 0.0  ;;  %v544_v29 = vadd.f32 %v2433_v25, %v3133_v48  ;;  %v535_v30 = vpop.f32.mrb[7].mxu1  ;;  %v649_v32 = vmax.f32 %v413_v18, 0.0  ;;  %v2688_v20 = vld [vmem:[%s4105_s5 + $0x30] sm:$0xff]  }
 0x101   :  { %v408_v33 = vadd.f32 %v3133_v48, %v407_v27  ;;  %v679_v34 = vmax.f32 %v533_v24, 0.0  ;;  %v536_v35 = vadd.f32 %v3133_v48, %v535_v30  ;;  %v647_v38 = vmax.f32 %v405_v22, 0.0  ;;  %2550 = vmatprep.subr.bf16.mxu0 %v2688_v20 }
 0x102   :  { %v650_v36 = vmax.f32 %v416_v26, 0.0  ;;  %v682_v37 = vmax.f32 %v544_v29, 0.0  ;;  %2551 = vmatpush3.bf16.msra.mxu0 %v2688_v20 }
 0x103   :  { %v648_v39 = vmax.f32 %v408_v33, 0.0  ;;  %v680_v40 = vmax.f32 %v536_v35, 0.0 }
 0x104   :  { %v710_v41 = vpack.c.bf16 %v650_v36, %v649_v32  ;;  %v3167_v42 = vpack.c.bf16 %v682_v37, %v681_v28 }
 0x105   :  { %v709_v43 = vpack.c.bf16 %v648_v39, %v647_v38  ;;  %v2404_v44 = vpop.f32.mrb[8].mxu0  ;;  %v3169_v45 = vpack.c.bf16 %v680_v40, %v679_v34  ;;  %v2436_v46 = vpop.f32.mrb[8].mxu1 }
 0x106   :  { %v429_v47 = vadd.f32 %v2404_v44, %v3133_v48  ;;  %v420_v49 = vpop.f32.mrb[9].mxu0  ;;  %v557_v50 = vadd.f32 %v2436_v46, %v3133_v48  ;;  %v548_v51 = vpop.f32.mrb[9].mxu1 }
 0x107   :  { %v421_v53 = vadd.f32 %v3133_v48, %v420_v49  ;;  %v2405_v54 = vpop.f32.mrb[10].mxu0  ;;  %2478 = vmatprep.mubr.bf16.mxu1 %v709_v43  ;;  %v549_v55 = vadd.f32 %v3133_v48, %v548_v51  ;;  %v2437_v56 = vpop.f32.mrb[10].mxu1 }
 0x108   :  { %v432_v57 = vadd.f32 %v2405_v54, %v3133_v48  ;;  %v423_v58 = vpop.f32.mrb[11].mxu0  ;;  %2479 = vmatmul.mubr.bf16.gmra.mrb[36].mxu1 %v710_v41  ;;  %v685_v59 = vmax.f32 %v557_v50, 0.0  ;;  %v560_v60 = vadd.f32 %v2437_v56, %v3133_v48  ;;  %v551_v61 = vpop.f32.mrb[11].mxu1  ;;  %v653_v1 = vmax.f32 %v429_v47, 0.0 }
 0x109   :  { %v424_v62 = vadd.f32 %v3133_v48, %v423_v58  ;;  %v683_v63 = vmax.f32 %v549_v55, 0.0  ;;  %v552_v0 = vadd.f32 %v3133_v48, %v551_v61  ;;  %v651_v5 = vmax.f32 %v421_v53, 0.0 }
 0x10a   :  { %v654_v2 = vmax.f32 %v432_v57, 0.0  ;;  %v686_v3 = vmax.f32 %v560_v60, 0.0 }
 0x10b   :  { %v652_v6 = vmax.f32 %v424_v62, 0.0  ;;  %v684_v7 = vmax.f32 %v552_v0, 0.0 }
 0x10c   :  { %v712_v8 = vpack.c.bf16 %v654_v2, %v653_v1  ;;  %v3185_v9 = vpack.c.bf16 %v686_v3, %v685_v59 }
 0x10d   :  { %v711_v10 = vpack.c.bf16 %v652_v6, %v651_v5  ;;  %v2408_v11 = vpop.f32.mrb[12].mxu0  ;;  %v3187_v13 = vpack.c.bf16 %v684_v7, %v683_v63  ;;  %v2440_v14 = vpop.f32.mrb[12].mxu1 }
 0x10e   :  { %v445_v16 = vadd.f32 %v2408_v11, %v3133_v48  ;;  %v436_v17 = vpop.f32.mrb[13].mxu0  ;;  %v573_v18 = vadd.f32 %v2440_v14, %v3133_v48  ;;  %v564_v19 = vpop.f32.mrb[13].mxu1 }
 0x10f   :  { %v437_v21 = vadd.f32 %v3133_v48, %v436_v17  ;;  %v2409_v22 = vpop.f32.mrb[14].mxu0  ;;  %2482 = vmatprep.mubr.bf16.mxu1 %v711_v10  ;;  %v565_v23 = vadd.f32 %v3133_v48, %v564_v19  ;;  %v2441_v24 = vpop.f32.mrb[14].mxu1 }
 0x110   :  { %v448_v25 = vadd.f32 %v2409_v22, %v3133_v48  ;;  %v439_v26 = vpop.f32.mrb[15].mxu0  ;;  %2483 = vmatmul.mubr.bf16.gmra.mrb[40].mxu1 %v712_v8  ;;  %v689_v27 = vmax.f32 %v573_v18, 0.0  ;;  %v576_v28 = vadd.f32 %v2441_v24, %v3133_v48  ;;  %v567_v29 = vpop.f32.mrb[15].mxu1  ;;  %v657_v33 = vmax.f32 %v445_v16, 0.0 }
 0x111   :  { %v440_v30 = vadd.f32 %v3133_v48, %v439_v26  ;;  %v687_v31 = vmax.f32 %v565_v23, 0.0  ;;  %v568_v32 = vadd.f32 %v3133_v48, %v567_v29  ;;  %v655_v36 = vmax.f32 %v437_v21, 0.0 }
 0x112   :  { %v658_v34 = vmax.f32 %v448_v25, 0.0  ;;  %v690_v35 = vmax.f32 %v576_v28, 0.0 }
 0x113   :  { %v656_v37 = vmax.f32 %v440_v30, 0.0  ;;  %v688_v38 = vmax.f32 %v568_v32, 0.0 }
 0x114   :  { %v714_v39 = vpack.c.bf16 %v658_v34, %v657_v33  ;;  %v3200_v40 = vpack.c.bf16 %v690_v35, %v689_v27 }
 0x115   :  { %v713_v41 = vpack.c.bf16 %v656_v37, %v655_v36  ;;  %v2412_v43 = vpop.f32.mrb[16].mxu0  ;;  %v3202_v44 = vpack.c.bf16 %v688_v38, %v687_v31  ;;  %v2444_v46 = vpop.f32.mrb[16].mxu1 }
 0x116   :  { %v461_v47 = vadd.f32 %v2412_v43, %v3133_v48  ;;  %v452_v49 = vpop.f32.mrb[17].mxu0  ;;  %v589_v50 = vadd.f32 %v2444_v46, %v3133_v48  ;;  %v580_v51 = vpop.f32.mrb[17].mxu1 }
 0x117   :  { %v453_v52 = vadd.f32 %v3133_v48, %v452_v49  ;;  %v2413_v53 = vpop.f32.mrb[18].mxu0  ;;  %2486 = vmatprep.mubr.bf16.mxu1 %v713_v41  ;;  %v581_v54 = vadd.f32 %v3133_v48, %v580_v51  ;;  %v2445_v55 = vpop.f32.mrb[18].mxu1 }
 0x118   :  { %v464_v56 = vadd.f32 %v2413_v53, %v3133_v48  ;;  %v455_v57 = vpop.f32.mrb[19].mxu0  ;;  %2487 = vmatmul.mubr.bf16.gmra.mrb[44].mxu1 %v714_v39  ;;  %v693_v58 = vmax.f32 %v589_v50, 0.0  ;;  %v592_v59 = vadd.f32 %v2445_v55, %v3133_v48  ;;  %v583_v60 = vpop.f32.mrb[19].mxu1  ;;  %v661_v0 = vmax.f32 %v461_v47, 0.0 }
 0x119   :  { %v456_v61 = vadd.f32 %v3133_v48, %v455_v57  ;;  %v691_v62 = vmax.f32 %v581_v54, 0.0  ;;  %v584_v63 = vadd.f32 %v3133_v48, %v583_v60  ;;  %v659_v3 = vmax.f32 %v453_v52, 0.0 }
 0x11a   :  { %v662_v1 = vmax.f32 %v464_v56, 0.0  ;;  %v694_v2 = vmax.f32 %v592_v59, 0.0 }
 0x11b   :  { %v660_v4 = vmax.f32 %v456_v61, 0.0  ;;  %v692_v5 = vmax.f32 %v584_v63, 0.0 }
 0x11c   :  { %v716_v6 = vpack.c.bf16 %v662_v1, %v661_v0  ;;  %v3212_v7 = vpack.c.bf16 %v694_v2, %v693_v58 }
 0x11d   :  { %v715_v8 = vpack.c.bf16 %v660_v4, %v659_v3  ;;  %v2416_v10 = vpop.f32.mrb[20].mxu0  ;;  %v3214_v11 = vpack.c.bf16 %v692_v5, %v691_v62  ;;  %v2448_v14 = vpop.f32.mrb[20].mxu1 }
 0x11e   :  { %v477_v16 = vadd.f32 %v2416_v10, %v3133_v48  ;;  %v468_v17 = vpop.f32.mrb[21].mxu0  ;;  %v605_v18 = vadd.f32 %v2448_v14, %v3133_v48  ;;  %v596_v19 = vpop.f32.mrb[21].mxu1 }
 0x11f   :  { %v469_v20 = vadd.f32 %v3133_v48, %v468_v17  ;;  %v2417_v21 = vpop.f32.mrb[22].mxu0  ;;  %2490 = vmatprep.mubr.bf16.mxu1 %v715_v8  ;;  %v597_v22 = vadd.f32 %v3133_v48, %v596_v19  ;;  %v2449_v23 = vpop.f32.mrb[22].mxu1 }
 0x120   :  { %v480_v24 = vadd.f32 %v2417_v21, %v3133_v48  ;;  %v471_v25 = vpop.f32.mrb[23].mxu0  ;;  %2491 = vmatmul.mubr.bf16.gmra.mrb[48].mxu1 %v716_v6  ;;  %v697_v26 = vmax.f32 %v605_v18, 0.0  ;;  %v608_v27 = vadd.f32 %v2449_v23, %v3133_v48  ;;  %v599_v28 = vpop.f32.mrb[23].mxu1  ;;  %v665_v32 = vmax.f32 %v477_v16, 0.0 }
 0x121   :  { %v472_v29 = vadd.f32 %v3133_v48, %v471_v25  ;;  %v695_v30 = vmax.f32 %v597_v22, 0.0  ;;  %v600_v31 = vadd.f32 %v3133_v48, %v599_v28  ;;  %v663_v35 = vmax.f32 %v469_v20, 0.0 }
 0x122   :  { %v666_v33 = vmax.f32 %v480_v24, 0.0  ;;  %v698_v34 = vmax.f32 %v608_v27, 0.0 }
 0x123   :  { %v664_v36 = vmax.f32 %v472_v29, 0.0  ;;  %v696_v37 = vmax.f32 %v600_v31, 0.0 }
 0x124   :  { %v718_v38 = vpack.c.bf16 %v666_v33, %v665_v32  ;;  %v3224_v39 = vpack.c.bf16 %v698_v34, %v697_v26 }
 0x125   :  { %v717_v41 = vpack.c.bf16 %v664_v36, %v663_v35  ;;  %v2420_v43 = vpop.f32.mrb[24].mxu0  ;;  %v3226_v46 = vpack.c.bf16 %v696_v37, %v695_v30  ;;  %v2452_v47 = vpop.f32.mrb[24].mxu1 }
 0x126   :  { %v493_v49 = vadd.f32 %v2420_v43, %v3133_v48  ;;  %v484_v50 = vpop.f32.mrb[25].mxu0  ;;  %v621_v51 = vadd.f32 %v2452_v47, %v3133_v48  ;;  %v612_v52 = vpop.f32.mrb[25].mxu1 }
 0x127   :  { %v485_v53 = vadd.f32 %v3133_v48, %v484_v50  ;;  %v2421_v54 = vpop.f32.mrb[26].mxu0  ;;  %2494 = vmatprep.mubr.bf16.mxu1 %v717_v41  ;;  %v613_v55 = vadd.f32 %v3133_v48, %v612_v52  ;;  %v2453_v56 = vpop.f32.mrb[26].mxu1 }
 0x128   :  { %v496_v57 = vadd.f32 %v2421_v54, %v3133_v48  ;;  %v487_v58 = vpop.f32.mrb[27].mxu0  ;;  %2495 = vmatmul.mubr.bf16.gmra.mrb[52].mxu1 %v718_v38  ;;  %v701_v59 = vmax.f32 %v621_v51, 0.0  ;;  %v624_v60 = vadd.f32 %v2453_v56, %v3133_v48  ;;  %v615_v61 = vpop.f32.mrb[27].mxu1  ;;  %v669_v1 = vmax.f32 %v493_v49, 0.0 }
 0x129   :  { %v488_v62 = vadd.f32 %v3133_v48, %v487_v58  ;;  %v699_v63 = vmax.f32 %v613_v55, 0.0  ;;  %v616_v0 = vadd.f32 %v3133_v48, %v615_v61  ;;  %v667_v4 = vmax.f32 %v485_v53, 0.0 }
 0x12a   :  { %v670_v2 = vmax.f32 %v496_v57, 0.0  ;;  %v702_v3 = vmax.f32 %v624_v60, 0.0 }
 0x12b   :  { %v668_v5 = vmax.f32 %v488_v62, 0.0  ;;  %v700_v6 = vmax.f32 %v616_v0, 0.0 }
 0x12c   :  { %v720_v8 = vpack.c.bf16 %v670_v2, %v669_v1  ;;  %v736_v10 = vpack.c.bf16 %v702_v3, %v701_v59 }
 0x12d   :  { %v719_v14 = vpack.c.bf16 %v668_v5, %v667_v4  ;;  %v2424_v16 = vpop.f32.mrb[28].mxu0  ;;  %v735_v17 = vpack.c.bf16 %v700_v6, %v699_v63  ;;  %v2456_v18 = vpop.f32.mrb[28].mxu1 }
 0x12e   :  { %v509_v19 = vadd.f32 %v2424_v16, %v3133_v48  ;;  %v500_v20 = vpop.f32.mrb[29].mxu0  ;;  %v637_v21 = vadd.f32 %v2456_v18, %v3133_v48  ;;  %v628_v22 = vpop.f32.mrb[29].mxu1 }
 0x12f   :  { %v501_v23 = vadd.f32 %v3133_v48, %v500_v20  ;;  %v2425_v24 = vpop.f32.mrb[30].mxu0  ;;  %2498 = vmatprep.mubr.bf16.mxu1 %v719_v14  ;;  %v629_v25 = vadd.f32 %v3133_v48, %v628_v22  ;;  %v2457_v26 = vpop.f32.mrb[30].mxu1 }
 0x130   :  { %v512_v27 = vadd.f32 %v2425_v24, %v3133_v48  ;;  %v503_v28 = vpop.f32.mrb[31].mxu0  ;;  %2499 = vmatmul.mubr.bf16.gmra.mrb[56].mxu1 %v720_v8  ;;  %v705_v29 = vmax.f32 %v637_v21, 0.0  ;;  %v640_v30 = vadd.f32 %v2457_v26, %v3133_v48  ;;  %v631_v31 = vpop.f32.mrb[31].mxu1  ;;  %v673_v35 = vmax.f32 %v509_v19, 0.0 }
 0x131   :  { %v504_v32 = vadd.f32 %v3133_v48, %v503_v28  ;;  %v703_v33 = vmax.f32 %v629_v25, 0.0  ;;  %v632_v34 = vadd.f32 %v3133_v48, %v631_v31  ;;  %v671_v38 = vmax.f32 %v501_v23, 0.0  ;;  %v2689_v48 = vld [vmem:[%s4105_s5 + $0x38] sm:$0xff]  }
 0x132   :  { %v674_v36 = vmax.f32 %v512_v27, 0.0  ;;  %v706_v37 = vmax.f32 %v640_v30, 0.0  ;;  %2552 = vmatprep.subr.bf16.mxu0 %v2689_v48 }
 0x133   :  { %v672_v41 = vmax.f32 %v504_v32, 0.0  ;;  %v704_v43 = vmax.f32 %v632_v34, 0.0  ;;  %2553 = vmatpush3.bf16.msra.mxu0 %v2689_v48 }
 0x134   :  { %v722_v47 = vpack.c.bf16 %v674_v36, %v673_v35  ;;  %v738_v49 = vpack.c.bf16 %v706_v37, %v705_v29 }
 0x135   :  { %v721_v50 = vpack.c.bf16 %v672_v41, %v671_v38  ;;  %v737_v51 = vpack.c.bf16 %v704_v43, %v703_v33 }
 0x137   :  { %2502 = vmatprep.mubr.bf16.mxu1 %v721_v50 }
 0x138   :  { %2503 = vmatmul.mubr.bf16.gmra.mrb[60].mxu1 %v722_v47 }
 0x139   :  { %2506 = vmatprep.mubr.bf16.mxu1 %v3151_v15 }
 0x140   :  { %2507 = vmatmul.mubr.bf16.gmra.mrb[64].mxu1 %v3149_v12  ;;  %v3262_v12 = vld [vmem:[%s4106_s4] ss:$0 sm:$0xff] }
 0x141   :  { %2510 = vmatprep.mubr.bf16.mxu1 %v3169_v45 }
 0x148   :  { %2511 = vmatmul.mubr.bf16.gmra.mrb[68].mxu1 %v3167_v42 }
 0x149   :  { %2514 = vmatprep.mubr.bf16.mxu1 %v3187_v13 }
 0x150   :  { %2515 = vmatmul.mubr.bf16.gmra.mrb[72].mxu1 %v3185_v9 }
 0x151   :  { %2518 = vmatprep.mubr.bf16.mxu1 %v3202_v44 }
 0x158   :  { %2519 = vmatmul.mubr.bf16.gmra.mrb[76].mxu1 %v3200_v40 }
 0x159   :  { %2522 = vmatprep.mubr.bf16.mxu1 %v3214_v11 }
 0x160   :  { %2523 = vmatmul.mubr.bf16.gmra.mrb[80].mxu1 %v3212_v7 }
 0x161   :  { %2526 = vmatprep.mubr.bf16.mxu1 %v3226_v46 }
 0x168   :  { %2527 = vmatmul.mubr.bf16.gmra.mrb[84].mxu1 %v3224_v39 }
 0x169   :  { %2530 = vmatprep.mubr.bf16.mxu1 %v735_v17 }
 0x170   :  { %2531 = vmatmul.mubr.bf16.gmra.mrb[88].mxu1 %v736_v10 }
 0x171   :  { %2534 = vmatprep.mubr.bf16.mxu1 %v737_v51 }
 0x178   :  { %2535 = vmatmul.mubr.bf16.gmra.mrb[92].mxu1 %v738_v49 }
 0x1d3   :  { %v2476_v15 = vpop.f32.mrb[32].mxu1 }
 0x1d4   :  { %v853_v42 = vadd.f32 %v2476_v15, %v3262_v12  ;;  %v844_v45 = vpop.f32.mrb[33].mxu1 }
 0x1d5   :  { %v845_v9 = vadd.f32 %v3262_v12, %v844_v45  ;;  %v2477_v13 = vpop.f32.mrb[34].mxu1 }
 0x1d6   :  { %v856_v40 = vadd.f32 %v2477_v13, %v3262_v12  ;;  %v847_v44 = vpop.f32.mrb[35].mxu1  ;;  %v1101_v11 = vmax.f32 %v853_v42, 0.0 }
 0x1d7   :  { %v848_v7 = vadd.f32 %v3262_v12, %v847_v44  ;;  %v1099_v46 = vmax.f32 %v845_v9, 0.0 }
 0x1d8   :  { %v1102_v39 = vmax.f32 %v856_v40, 0.0 }
 0x1d9   :  { %v1100_v52 = vmax.f32 %v848_v7, 0.0 }
 0x1da   :  { %v1164_v53 = vpack.c.bf16 %v1102_v39, %v1101_v11 }
 0x1db   :  { %v1163_v54 = vpack.c.bf16 %v1100_v52, %v1099_v46  ;;  %v2480_v55 = vpop.f32.mrb[36].mxu1 }
 0x1dc   :  { %v869_v56 = vadd.f32 %v2480_v55, %v3262_v12  ;;  %v860_v57 = vpop.f32.mrb[37].mxu1 }
 0x1dd   :  { %v861_v58 = vadd.f32 %v3262_v12, %v860_v57  ;;  %v2481_v59 = vpop.f32.mrb[38].mxu1  ;;  %2554 = vmatprep.mubr.bf16.mxu0 %v1163_v54 }
 0x1de   :  { %v872_v60 = vadd.f32 %v2481_v59, %v3262_v12  ;;  %v863_v61 = vpop.f32.mrb[39].mxu1  ;;  %2555 = vmatmul.mubr.bf16.vlgmr.msra.gmra.mrb[32].mxu0 %v1164_v53  ;;  %v1105_v63 = vmax.f32 %v869_v56, 0.0 }
 0x1df   :  { %v864_v62 = vadd.f32 %v3262_v12, %v863_v61  ;;  %v1103_v1 = vmax.f32 %v861_v58, 0.0 }
 0x1e0   :  { %v1106_v0 = vmax.f32 %v872_v60, 0.0 }
 0x1e1   :  { %v1104_v2 = vmax.f32 %v864_v62, 0.0 }
 0x1e2   :  { %v1166_v3 = vpack.c.bf16 %v1106_v0, %v1105_v63 }
 0x1e3   :  { %v1165_v4 = vpack.c.bf16 %v1104_v2, %v1103_v1  ;;  %v2484_v5 = vpop.f32.mrb[40].mxu1 }
 0x1e4   :  { %v885_v6 = vadd.f32 %v2484_v5, %v3262_v12  ;;  %v876_v8 = vpop.f32.mrb[41].mxu1 }
 0x1e5   :  { %v877_v10 = vadd.f32 %v3262_v12, %v876_v8  ;;  %v2485_v14 = vpop.f32.mrb[42].mxu1  ;;  %2558 = vmatprep.mubr.bf16.mxu0 %v1165_v4 }
 0x1e6   :  { %v888_v16 = vadd.f32 %v2485_v14, %v3262_v12  ;;  %v879_v17 = vpop.f32.mrb[43].mxu1  ;;  %2559 = vmatmul.mubr.bf16.gmra.mrb[36].mxu0 %v1166_v3  ;;  %v1109_v19 = vmax.f32 %v885_v6, 0.0 }
 0x1e7   :  { %v880_v18 = vadd.f32 %v3262_v12, %v879_v17  ;;  %v1107_v21 = vmax.f32 %v877_v10, 0.0 }
 0x1e8   :  { %v1110_v20 = vmax.f32 %v888_v16, 0.0 }
 0x1e9   :  { %v1108_v22 = vmax.f32 %v880_v18, 0.0 }
 0x1ea   :  { %v1168_v23 = vpack.c.bf16 %v1110_v20, %v1109_v19 }
 0x1eb   :  { %v1167_v24 = vpack.c.bf16 %v1108_v22, %v1107_v21  ;;  %v2488_v25 = vpop.f32.mrb[44].mxu1 }
 0x1ec   :  { %v901_v26 = vadd.f32 %v2488_v25, %v3262_v12  ;;  %v892_v27 = vpop.f32.mrb[45].mxu1 }
 0x1ed   :  { %v893_v28 = vadd.f32 %v3262_v12, %v892_v27  ;;  %v2489_v29 = vpop.f32.mrb[46].mxu1  ;;  %2562 = vmatprep.mubr.bf16.mxu0 %v1167_v24 }
 0x1ee   :  { %v904_v30 = vadd.f32 %v2489_v29, %v3262_v12  ;;  %v895_v31 = vpop.f32.mrb[47].mxu1  ;;  %2563 = vmatmul.mubr.bf16.gmra.mrb[40].mxu0 %v1168_v23  ;;  %v1113_v33 = vmax.f32 %v901_v26, 0.0 }
 0x1ef   :  { %v896_v32 = vadd.f32 %v3262_v12, %v895_v31  ;;  %v1111_v35 = vmax.f32 %v893_v28, 0.0 }
 0x1f0   :  { %v1114_v34 = vmax.f32 %v904_v30, 0.0 }
 0x1f1   :  { %v1112_v36 = vmax.f32 %v896_v32, 0.0 }
 0x1f2   :  { %v1170_v37 = vpack.c.bf16 %v1114_v34, %v1113_v33 }
 0x1f3   :  { %v1169_v38 = vpack.c.bf16 %v1112_v36, %v1111_v35  ;;  %v2492_v41 = vpop.f32.mrb[48].mxu1 }
 0x1f4   :  { %v917_v43 = vadd.f32 %v2492_v41, %v3262_v12  ;;  %v908_v47 = vpop.f32.mrb[49].mxu1 }
 0x1f5   :  { %v909_v49 = vadd.f32 %v3262_v12, %v908_v47  ;;  %v2493_v50 = vpop.f32.mrb[50].mxu1  ;;  %2566 = vmatprep.mubr.bf16.mxu0 %v1169_v38 }
 0x1f6   :  { %v920_v51 = vadd.f32 %v2493_v50, %v3262_v12  ;;  %v911_v48 = vpop.f32.mrb[51].mxu1  ;;  %2567 = vmatmul.mubr.bf16.gmra.mrb[44].mxu0 %v1170_v37  ;;  %v1117_v42 = vmax.f32 %v917_v43, 0.0 }
 0x1f7   :  { %v912_v15 = vadd.f32 %v3262_v12, %v911_v48  ;;  %v1115_v9 = vmax.f32 %v909_v49, 0.0 }
 0x1f8   :  { %v1118_v45 = vmax.f32 %v920_v51, 0.0 }
 0x1f9   :  { %v1116_v13 = vmax.f32 %v912_v15, 0.0 }
 0x1fa   :  { %v1172_v40 = vpack.c.bf16 %v1118_v45, %v1117_v42 }
 0x1fb   :  { %v1171_v44 = vpack.c.bf16 %v1116_v13, %v1115_v9  ;;  %v2496_v7 = vpop.f32.mrb[52].mxu1 }
 0x1fc   :  { %v933_v11 = vadd.f32 %v2496_v7, %v3262_v12  ;;  %v924_v39 = vpop.f32.mrb[53].mxu1 }
 0x1fd   :  { %v925_v46 = vadd.f32 %v3262_v12, %v924_v39  ;;  %v2497_v52 = vpop.f32.mrb[54].mxu1  ;;  %2570 = vmatprep.mubr.bf16.mxu0 %v1171_v44 }
 0x1fe   :  { %v936_v53 = vadd.f32 %v2497_v52, %v3262_v12  ;;  %v927_v54 = vpop.f32.mrb[55].mxu1  ;;  %2571 = vmatmul.mubr.bf16.gmra.mrb[48].mxu0 %v1172_v40  ;;  %v1121_v56 = vmax.f32 %v933_v11, 0.0 }
 0x1ff   :  { %v928_v55 = vadd.f32 %v3262_v12, %v927_v54  ;;  %v1119_v58 = vmax.f32 %v925_v46, 0.0 }
 0x200   :  { %v1122_v57 = vmax.f32 %v936_v53, 0.0 }
 0x201   :  { %v1120_v59 = vmax.f32 %v928_v55, 0.0 }
 0x202   :  { %v1174_v60 = vpack.c.bf16 %v1122_v57, %v1121_v56 }
 0x203   :  { %v1173_v61 = vpack.c.bf16 %v1120_v59, %v1119_v58  ;;  %v2500_v62 = vpop.f32.mrb[56].mxu1 }
 0x204   :  { %v949_v63 = vadd.f32 %v2500_v62, %v3262_v12  ;;  %v940_v0 = vpop.f32.mrb[57].mxu1 }
 0x205   :  { %v941_v1 = vadd.f32 %v3262_v12, %v940_v0  ;;  %v2501_v2 = vpop.f32.mrb[58].mxu1  ;;  %2574 = vmatprep.mubr.bf16.mxu0 %v1173_v61 }
 0x206   :  { %v952_v3 = vadd.f32 %v2501_v2, %v3262_v12  ;;  %v943_v4 = vpop.f32.mrb[59].mxu1  ;;  %2575 = vmatmul.mubr.bf16.gmra.mrb[52].mxu0 %v1174_v60  ;;  %v1125_v6 = vmax.f32 %v949_v63, 0.0 }
 0x207   :  { %v944_v5 = vadd.f32 %v3262_v12, %v943_v4  ;;  %v1123_v10 = vmax.f32 %v941_v1, 0.0 }
 0x208   :  { %v1126_v8 = vmax.f32 %v952_v3, 0.0 }
 0x209   :  { %v1124_v14 = vmax.f32 %v944_v5, 0.0 }
 0x20a   :  { %v1176_v16 = vpack.c.bf16 %v1126_v8, %v1125_v6 }
 0x20b   :  { %v1175_v17 = vpack.c.bf16 %v1124_v14, %v1123_v10  ;;  %v2504_v18 = vpop.f32.mrb[60].mxu1 }
 0x20c   :  { %v965_v19 = vadd.f32 %v2504_v18, %v3262_v12  ;;  %v956_v20 = vpop.f32.mrb[61].mxu1 }
 0x20d   :  { %v957_v21 = vadd.f32 %v3262_v12, %v956_v20  ;;  %v2505_v22 = vpop.f32.mrb[62].mxu1  ;;  %2578 = vmatprep.mubr.bf16.mxu0 %v1175_v17 }
 0x20e   :  { %v968_v23 = vadd.f32 %v2505_v22, %v3262_v12  ;;  %v959_v24 = vpop.f32.mrb[63].mxu1  ;;  %2579 = vmatmul.mubr.bf16.gmra.mrb[56].mxu0 %v1176_v16  ;;  %v1129_v26 = vmax.f32 %v965_v19, 0.0 }
 0x20f   :  { %v960_v25 = vadd.f32 %v3262_v12, %v959_v24  ;;  %v1127_v28 = vmax.f32 %v957_v21, 0.0 }
 0x210   :  { %v1130_v27 = vmax.f32 %v968_v23, 0.0 }
 0x211   :  { %v1128_v29 = vmax.f32 %v960_v25, 0.0 }
 0x212   :  { %v1178_v30 = vpack.c.bf16 %v1130_v27, %v1129_v26 }
 0x213   :  { %v1177_v31 = vpack.c.bf16 %v1128_v29, %v1127_v28  ;;  %v2508_v32 = vpop.f32.mrb[64].mxu1 }
 0x214   :  { %v981_v33 = vadd.f32 %v2508_v32, %v3262_v12  ;;  %v972_v34 = vpop.f32.mrb[65].mxu1 }
 0x215   :  { %v973_v35 = vadd.f32 %v3262_v12, %v972_v34  ;;  %v2509_v36 = vpop.f32.mrb[66].mxu1  ;;  %2582 = vmatprep.mubr.bf16.mxu0 %v1177_v31 }
 0x216   :  { %v984_v37 = vadd.f32 %v2509_v36, %v3262_v12  ;;  %v975_v38 = vpop.f32.mrb[67].mxu1  ;;  %2583 = vmatmul.mubr.bf16.gmra.mrb[60].mxu0 %v1178_v30  ;;  %v1133_v43 = vmax.f32 %v981_v33, 0.0 }
 0x217   :  { %v976_v41 = vadd.f32 %v3262_v12, %v975_v38  ;;  %v1131_v49 = vmax.f32 %v973_v35, 0.0 }
 0x218   :  { %v1134_v47 = vmax.f32 %v984_v37, 0.0 }
 0x219   :  { %v1132_v50 = vmax.f32 %v976_v41, 0.0 }
 0x21a   :  { %v1180_v51 = vpack.c.bf16 %v1134_v47, %v1133_v43 }
 0x21b   :  { %v1179_v48 = vpack.c.bf16 %v1132_v50, %v1131_v49  ;;  %v2512_v15 = vpop.f32.mrb[68].mxu1 }
 0x21c   :  { %v997_v42 = vadd.f32 %v2512_v15, %v3262_v12  ;;  %v988_v45 = vpop.f32.mrb[69].mxu1 }
 0x21d   :  { %v989_v9 = vadd.f32 %v3262_v12, %v988_v45  ;;  %v2513_v13 = vpop.f32.mrb[70].mxu1  ;;  %2586 = vmatprep.mubr.bf16.mxu0 %v1179_v48 }
 0x21e   :  { %v1000_v40 = vadd.f32 %v2513_v13, %v3262_v12  ;;  %v991_v44 = vpop.f32.mrb[71].mxu1  ;;  %2587 = vmatmul.mubr.bf16.gmra.mrb[64].mxu0 %v1180_v51  ;;  %v1137_v11 = vmax.f32 %v997_v42, 0.0 }
 0x21f   :  { %v992_v7 = vadd.f32 %v3262_v12, %v991_v44  ;;  %v1135_v46 = vmax.f32 %v989_v9, 0.0 }
 0x220   :  { %v1138_v39 = vmax.f32 %v1000_v40, 0.0 }
 0x221   :  { %v1136_v52 = vmax.f32 %v992_v7, 0.0 }
 0x222   :  { %v1182_v53 = vpack.c.bf16 %v1138_v39, %v1137_v11 }
 0x223   :  { %v1181_v54 = vpack.c.bf16 %v1136_v52, %v1135_v46  ;;  %v2516_v55 = vpop.f32.mrb[72].mxu1 }
 0x224   :  { %v1013_v56 = vadd.f32 %v2516_v55, %v3262_v12  ;;  %v1004_v57 = vpop.f32.mrb[73].mxu1 }
 0x225   :  { %v1005_v58 = vadd.f32 %v3262_v12, %v1004_v57  ;;  %v2517_v59 = vpop.f32.mrb[74].mxu1  ;;  %2590 = vmatprep.mubr.bf16.mxu0 %v1181_v54 }
 0x226   :  { %v1016_v60 = vadd.f32 %v2517_v59, %v3262_v12  ;;  %v1007_v61 = vpop.f32.mrb[75].mxu1  ;;  %2591 = vmatmul.mubr.bf16.gmra.mrb[68].mxu0 %v1182_v53  ;;  %v1141_v63 = vmax.f32 %v1013_v56, 0.0 }
 0x227   :  { %v1008_v62 = vadd.f32 %v3262_v12, %v1007_v61  ;;  %v1139_v1 = vmax.f32 %v1005_v58, 0.0 }
 0x228   :  { %v1142_v0 = vmax.f32 %v1016_v60, 0.0 }
 0x229   :  { %v1140_v2 = vmax.f32 %v1008_v62, 0.0 }
 0x22a   :  { %v1184_v3 = vpack.c.bf16 %v1142_v0, %v1141_v63 }
 0x22b   :  { %v1183_v4 = vpack.c.bf16 %v1140_v2, %v1139_v1  ;;  %v2520_v5 = vpop.f32.mrb[76].mxu1 }
 0x22c   :  { %v1029_v6 = vadd.f32 %v2520_v5, %v3262_v12  ;;  %v1020_v8 = vpop.f32.mrb[77].mxu1 }
 0x22d   :  { %v1021_v10 = vadd.f32 %v3262_v12, %v1020_v8  ;;  %v2521_v14 = vpop.f32.mrb[78].mxu1  ;;  %2594 = vmatprep.mubr.bf16.mxu0 %v1183_v4 }
 0x22e   :  { %v1032_v16 = vadd.f32 %v2521_v14, %v3262_v12  ;;  %v1023_v17 = vpop.f32.mrb[79].mxu1  ;;  %2595 = vmatmul.mubr.bf16.gmra.mrb[72].mxu0 %v1184_v3  ;;  %v1145_v19 = vmax.f32 %v1029_v6, 0.0 }
 0x22f   :  { %v1024_v18 = vadd.f32 %v3262_v12, %v1023_v17  ;;  %v1143_v21 = vmax.f32 %v1021_v10, 0.0 }
 0x230   :  { %v1146_v20 = vmax.f32 %v1032_v16, 0.0 }
 0x231   :  { %v1144_v22 = vmax.f32 %v1024_v18, 0.0  ;;  %v3331_v18 = vld [vmem:[%s4107_s6] ss:$0 sm:$0xff] }
 0x232   :  { %v1186_v23 = vpack.c.bf16 %v1146_v20, %v1145_v19 }
 0x233   :  { %v1185_v24 = vpack.c.bf16 %v1144_v22, %v1143_v21  ;;  %v2524_v25 = vpop.f32.mrb[80].mxu1 }
 0x234   :  { %v1045_v26 = vadd.f32 %v2524_v25, %v3262_v12  ;;  %v1036_v27 = vpop.f32.mrb[81].mxu1 }
 0x235   :  { %v1037_v28 = vadd.f32 %v3262_v12, %v1036_v27  ;;  %v2525_v29 = vpop.f32.mrb[82].mxu1  ;;  %2598 = vmatprep.mubr.bf16.mxu0 %v1185_v24 }
 0x236   :  { %v1048_v30 = vadd.f32 %v2525_v29, %v3262_v12  ;;  %v1039_v31 = vpop.f32.mrb[83].mxu1  ;;  %2599 = vmatmul.mubr.bf16.gmra.mrb[76].mxu0 %v1186_v23  ;;  %v1149_v33 = vmax.f32 %v1045_v26, 0.0 }
 0x237   :  { %v1040_v32 = vadd.f32 %v3262_v12, %v1039_v31  ;;  %v1147_v35 = vmax.f32 %v1037_v28, 0.0 }
 0x238   :  { %v1150_v34 = vmax.f32 %v1048_v30, 0.0 }
 0x239   :  { %v1148_v36 = vmax.f32 %v1040_v32, 0.0 }
 0x23a   :  { %v1188_v37 = vpack.c.bf16 %v1150_v34, %v1149_v33 }
 0x23b   :  { %v1187_v38 = vpack.c.bf16 %v1148_v36, %v1147_v35  ;;  %v2528_v41 = vpop.f32.mrb[84].mxu1 }
 0x23c   :  { %v1061_v43 = vadd.f32 %v2528_v41, %v3262_v12  ;;  %v1052_v47 = vpop.f32.mrb[85].mxu1 }
 0x23d   :  { %v1053_v49 = vadd.f32 %v3262_v12, %v1052_v47  ;;  %v2529_v50 = vpop.f32.mrb[86].mxu1  ;;  %2602 = vmatprep.mubr.bf16.mxu0 %v1187_v38 }
 0x23e   :  { %v1064_v51 = vadd.f32 %v2529_v50, %v3262_v12  ;;  %v1055_v48 = vpop.f32.mrb[87].mxu1  ;;  %2603 = vmatmul.mubr.bf16.gmra.mrb[80].mxu0 %v1188_v37  ;;  %v1153_v42 = vmax.f32 %v1061_v43, 0.0 }
 0x23f   :  { %v1056_v15 = vadd.f32 %v3262_v12, %v1055_v48  ;;  %v1151_v9 = vmax.f32 %v1053_v49, 0.0 }
 0x240   :  { %v1154_v45 = vmax.f32 %v1064_v51, 0.0 }
 0x241   :  { %v1152_v13 = vmax.f32 %v1056_v15, 0.0 }
 0x242   :  { %v1190_v40 = vpack.c.bf16 %v1154_v45, %v1153_v42 }
 0x243   :  { %v1189_v44 = vpack.c.bf16 %v1152_v13, %v1151_v9  ;;  %v2532_v7 = vpop.f32.mrb[88].mxu1 }
 0x244   :  { %v1077_v11 = vadd.f32 %v2532_v7, %v3262_v12  ;;  %v1068_v39 = vpop.f32.mrb[89].mxu1 }
 0x245   :  { %v1069_v46 = vadd.f32 %v3262_v12, %v1068_v39  ;;  %v2533_v52 = vpop.f32.mrb[90].mxu1  ;;  %2606 = vmatprep.mubr.bf16.mxu0 %v1189_v44 }
 0x246   :  { %v1080_v53 = vadd.f32 %v2533_v52, %v3262_v12  ;;  %v1071_v54 = vpop.f32.mrb[91].mxu1  ;;  %2607 = vmatmul.mubr.bf16.gmra.mrb[84].mxu0 %v1190_v40  ;;  %v1157_v56 = vmax.f32 %v1077_v11, 0.0 }
 0x247   :  { %v1072_v55 = vadd.f32 %v3262_v12, %v1071_v54  ;;  %v1155_v58 = vmax.f32 %v1069_v46, 0.0 }
 0x248   :  { %v1158_v57 = vmax.f32 %v1080_v53, 0.0 }
 0x249   :  { %v1156_v59 = vmax.f32 %v1072_v55, 0.0 }
 0x24a   :  { %v1192_v60 = vpack.c.bf16 %v1158_v57, %v1157_v56 }
 0x24b   :  { %v1191_v61 = vpack.c.bf16 %v1156_v59, %v1155_v58  ;;  %v2536_v62 = vpop.f32.mrb[92].mxu1 }
 0x24c   :  { %v1093_v63 = vadd.f32 %v2536_v62, %v3262_v12  ;;  %v1084_v0 = vpop.f32.mrb[93].mxu1 }
 0x24d   :  { %v1085_v1 = vadd.f32 %v3262_v12, %v1084_v0  ;;  %v2537_v2 = vpop.f32.mrb[94].mxu1  ;;  %2610 = vmatprep.mubr.bf16.mxu0 %v1191_v61 }
 0x24e   :  { %v1096_v3 = vadd.f32 %v2537_v2, %v3262_v12  ;;  %v1087_v4 = vpop.f32.mrb[95].mxu1  ;;  %2611 = vmatmul.mubr.bf16.gmra.mrb[88].mxu0 %v1192_v60  ;;  %v1161_v6 = vmax.f32 %v1093_v63, 0.0 }
 0x24f   :  { %v1088_v5 = vadd.f32 %v3262_v12, %v1087_v4  ;;  %v1159_v10 = vmax.f32 %v1085_v1, 0.0 }
 0x250   :  { %v1162_v8 = vmax.f32 %v1096_v3, 0.0 }
 0x251   :  { %v1160_v14 = vmax.f32 %v1088_v5, 0.0 }
 0x252   :  { %v1194_v16 = vpack.c.bf16 %v1162_v8, %v1161_v6 }
 0x253   :  { %v1193_v17 = vpack.c.bf16 %v1160_v14, %v1159_v10 }
 0x255   :  { %2614 = vmatprep.mubr.bf16.mxu0 %v1193_v17 }
 0x256   :  { %2615 = vmatmul.mubr.bf16.gmra.mrb[92].mxu0 %v1194_v16 }
 0x2b1   :  { %v2556_v19 = vpop.f32.mrb[32].mxu0 }
 0x2b2   :  { %v3334_v20 = vadd.f32 %v2556_v19, %v3331_v18  ;;  %v1300_v21 = vpop.f32.mrb[33].mxu0 }
 0x2b3   :  { %v3337_v12 = vadd.f32 %v3331_v18, %v1300_v21  ;;  %v2557_v22 = vpop.f32.mrb[34].mxu0 }
 0x2b4   :  { %1559 = vmax.xlane.f32.xlu1 %v3334_v20  ;;  %v1303_v23 = vpop.f32.mrb[35].mxu0  ;;  %v3342_v24 = vadd.f32 %v2557_v22, %v3331_v18 }
 0x2b5   :  { %1555 = vmax.xlane.f32.xlu0 %v3337_v12  ;;  %v3345_v25 = vadd.f32 %v3331_v18, %v1303_v23 }
 0x2b8   :  { %1561 = vmax.xlane.f32.xlu1 %v3342_v24 }
 0x2b9   :  { %v2560_v26 = vpop.f32.mrb[36].mxu0  ;;  %1557 = vmax.xlane.f32.xlu0 %v3345_v25 }
 0x2ba   :  { %v3350_v27 = vadd.f32 %v2560_v26, %v3331_v18  ;;  %v1316_v28 = vpop.f32.mrb[37].mxu0 }
 0x2bb   :  { %v2561_v29 = vpop.f32.mrb[38].mxu0  ;;  %v3358_v32 = vadd.f32 %v3331_v18, %v1316_v28 }
 0x2bc   :  { %v3353_v30 = vadd.f32 %v2561_v29, %v3331_v18  ;;  %v1319_v31 = vpop.f32.mrb[39].mxu0 }
 0x2bd   :  { %1567 = vmax.xlane.f32.xlu0 %v3350_v27  ;;  %v3361_v33 = vadd.f32 %v3331_v18, %v1319_v31 }
 0x2be   :  { %1569 = vmax.xlane.f32.xlu1 %v3353_v30 }
 0x2c1   :  { %v2564_v34 = vpop.f32.mrb[40].mxu0  ;;  %1563 = vmax.xlane.f32.xlu0 %v3358_v32 }
 0x2c2   :  { %v3365_v35 = vadd.f32 %v2564_v34, %v3331_v18  ;;  %v1332_v36 = vpop.f32.mrb[41].mxu0  ;;  %1565 = vmax.xlane.f32.xlu1 %v3361_v33 }
 0x2c3   :  { %v2565_v37 = vpop.f32.mrb[42].mxu0  ;;  %v3374_v43 = vadd.f32 %v3331_v18, %v1332_v36 }
 0x2c4   :  { %v3369_v38 = vadd.f32 %v2565_v37, %v3331_v18  ;;  %v1335_v41 = vpop.f32.mrb[43].mxu0 }
 0x2c5   :  { %1575 = vmax.xlane.f32.xlu0 %v3365_v35  ;;  %v3377_v47 = vadd.f32 %v3331_v18, %v1335_v41 }
 0x2c6   :  { %1577 = vmax.xlane.f32.xlu1 %v3369_v38 }
 0x2c9   :  { %v2568_v49 = vpop.f32.mrb[44].mxu0  ;;  %1571 = vmax.xlane.f32.xlu0 %v3374_v43 }
 0x2ca   :  { %v3381_v50 = vadd.f32 %v2568_v49, %v3331_v18  ;;  %v1348_v51 = vpop.f32.mrb[45].mxu0  ;;  %1573 = vmax.xlane.f32.xlu1 %v3377_v47 }
 0x2cb   :  { %v2569_v48 = vpop.f32.mrb[46].mxu0  ;;  %v3390_v45 = vadd.f32 %v3331_v18, %v1348_v51 }
 0x2cc   :  { %v3385_v15 = vadd.f32 %v2569_v48, %v3331_v18  ;;  %v1351_v42 = vpop.f32.mrb[47].mxu0 }
 0x2cd   :  { %1583 = vmax.xlane.f32.xlu0 %v3381_v50  ;;  %v3393_v9 = vadd.f32 %v3331_v18, %v1351_v42 }
 0x2ce   :  { %1585 = vmax.xlane.f32.xlu1 %v3385_v15 }
 0x2d1   :  { %v2572_v13 = vpop.f32.mrb[48].mxu0  ;;  %1579 = vmax.xlane.f32.xlu0 %v3390_v45 }
 0x2d2   :  { %v3397_v40 = vadd.f32 %v2572_v13, %v3331_v18  ;;  %v1364_v44 = vpop.f32.mrb[49].mxu0  ;;  %1581 = vmax.xlane.f32.xlu1 %v3393_v9 }
 0x2d3   :  { %v2573_v7 = vpop.f32.mrb[50].mxu0  ;;  %v3406_v46 = vadd.f32 %v3331_v18, %v1364_v44 }
 0x2d4   :  { %v3401_v11 = vadd.f32 %v2573_v7, %v3331_v18  ;;  %v1367_v39 = vpop.f32.mrb[51].mxu0 }
 0x2d5   :  { %1591 = vmax.xlane.f32.xlu0 %v3397_v40  ;;  %v3409_v52 = vadd.f32 %v3331_v18, %v1367_v39 }
 0x2d6   :  { %1593 = vmax.xlane.f32.xlu1 %v3401_v11 }
 0x2d9   :  { %v2576_v53 = vpop.f32.mrb[52].mxu0  ;;  %1587 = vmax.xlane.f32.xlu0 %v3406_v46 }
 0x2da   :  { %v3413_v54 = vadd.f32 %v2576_v53, %v3331_v18  ;;  %v1380_v55 = vpop.f32.mrb[53].mxu0  ;;  %1589 = vmax.xlane.f32.xlu1 %v3409_v52 }
 0x2db   :  { %v2577_v56 = vpop.f32.mrb[54].mxu0  ;;  %v3422_v59 = vadd.f32 %v3331_v18, %v1380_v55 }
 0x2dc   :  { %v3417_v57 = vadd.f32 %v2577_v56, %v3331_v18  ;;  %v1383_v58 = vpop.f32.mrb[55].mxu0 }
 0x2dd   :  { %1599 = vmax.xlane.f32.xlu0 %v3413_v54  ;;  %v3425_v60 = vadd.f32 %v3331_v18, %v1383_v58 }
 0x2de   :  { %1601 = vmax.xlane.f32.xlu1 %v3417_v57 }
 0x2e1   :  { %v2580_v61 = vpop.f32.mrb[56].mxu0  ;;  %1595 = vmax.xlane.f32.xlu0 %v3422_v59 }
 0x2e2   :  { %v3429_v62 = vadd.f32 %v2580_v61, %v3331_v18  ;;  %v1396_v63 = vpop.f32.mrb[57].mxu0  ;;  %1597 = vmax.xlane.f32.xlu1 %v3425_v60 }
 0x2e3   :  { %v2581_v0 = vpop.f32.mrb[58].mxu0  ;;  %v3438_v3 = vadd.f32 %v3331_v18, %v1396_v63 }
 0x2e4   :  { %v3433_v1 = vadd.f32 %v2581_v0, %v3331_v18  ;;  %v1399_v2 = vpop.f32.mrb[59].mxu0 }
 0x2e5   :  { %1607 = vmax.xlane.f32.xlu0 %v3429_v62  ;;  %v3441_v4 = vadd.f32 %v3331_v18, %v1399_v2 }
 0x2e6   :  { %1609 = vmax.xlane.f32.xlu1 %v3433_v1 }
 0x2e9   :  { %v2584_v5 = vpop.f32.mrb[60].mxu0  ;;  %1603 = vmax.xlane.f32.xlu0 %v3438_v3 }
 0x2ea   :  { %v3445_v6 = vadd.f32 %v2584_v5, %v3331_v18  ;;  %v1412_v8 = vpop.f32.mrb[61].mxu0  ;;  %1605 = vmax.xlane.f32.xlu1 %v3441_v4 }
 0x2eb   :  { %v2585_v10 = vpop.f32.mrb[62].mxu0  ;;  %v3454_v17 = vadd.f32 %v3331_v18, %v1412_v8 }
 0x2ec   :  { %v3449_v14 = vadd.f32 %v2585_v10, %v3331_v18  ;;  %v1415_v16 = vpop.f32.mrb[63].mxu0 }
 0x2ed   :  { %1615 = vmax.xlane.f32.xlu0 %v3445_v6  ;;  %v3457_v19 = vadd.f32 %v3331_v18, %v1415_v16 }
 0x2ee   :  { %1617 = vmax.xlane.f32.xlu1 %v3449_v14 }
 0x2f1   :  { %v2588_v21 = vpop.f32.mrb[64].mxu0  ;;  %1611 = vmax.xlane.f32.xlu0 %v3454_v17 }
 0x2f2   :  { %v3461_v22 = vadd.f32 %v2588_v21, %v3331_v18  ;;  %v1428_v23 = vpop.f32.mrb[65].mxu0  ;;  %1613 = vmax.xlane.f32.xlu1 %v3457_v19 }
 0x2f3   :  { %v2589_v26 = vpop.f32.mrb[66].mxu0  ;;  %v3470_v31 = vadd.f32 %v3331_v18, %v1428_v23 }
 0x2f4   :  { %v3465_v28 = vadd.f32 %v2589_v26, %v3331_v18  ;;  %v1431_v29 = vpop.f32.mrb[67].mxu0 }
 0x2f5   :  { %1623 = vmax.xlane.f32.xlu0 %v3461_v22  ;;  %v3473_v34 = vadd.f32 %v3331_v18, %v1431_v29 }
 0x2f6   :  { %1625 = vmax.xlane.f32.xlu1 %v3465_v28 }
 0x2f9   :  { %v2592_v36 = vpop.f32.mrb[68].mxu0  ;;  %1619 = vmax.xlane.f32.xlu0 %v3470_v31 }
 0x2fa   :  { %v3477_v37 = vadd.f32 %v2592_v36, %v3331_v18  ;;  %v1444_v41 = vpop.f32.mrb[69].mxu0  ;;  %1621 = vmax.xlane.f32.xlu1 %v3473_v34 }
 0x2fb   :  { %v2593_v49 = vpop.f32.mrb[70].mxu0  ;;  %v3486_v42 = vadd.f32 %v3331_v18, %v1444_v41 }
 0x2fc   :  { %v3481_v51 = vadd.f32 %v2593_v49, %v3331_v18  ;;  %v1447_v48 = vpop.f32.mrb[71].mxu0 }
 0x2fd   :  { %1631 = vmax.xlane.f32.xlu0 %v3477_v37  ;;  %v3489_v13 = vadd.f32 %v3331_v18, %v1447_v48 }
 0x2fe   :  { %1633 = vmax.xlane.f32.xlu1 %v3481_v51 }
 0x301   :  { %v2596_v44 = vpop.f32.mrb[72].mxu0  ;;  %1627 = vmax.xlane.f32.xlu0 %v3486_v42 }
 0x302   :  { %v3493_v7 = vadd.f32 %v2596_v44, %v3331_v18  ;;  %v1460_v39 = vpop.f32.mrb[73].mxu0  ;;  %1629 = vmax.xlane.f32.xlu1 %v3489_v13 }
 0x303   :  { %v2597_v53 = vpop.f32.mrb[74].mxu0  ;;  %v3502_v58 = vadd.f32 %v3331_v18, %v1460_v39 }
 0x304   :  { %v3497_v55 = vadd.f32 %v2597_v53, %v3331_v18  ;;  %v1463_v56 = vpop.f32.mrb[75].mxu0 }
 0x305   :  { %1639 = vmax.xlane.f32.xlu0 %v3493_v7  ;;  %v3505_v61 = vadd.f32 %v3331_v18, %v1463_v56 }
 0x306   :  { %1641 = vmax.xlane.f32.xlu1 %v3497_v55 }
 0x309   :  { %v2600_v63 = vpop.f32.mrb[76].mxu0  ;;  %1635 = vmax.xlane.f32.xlu0 %v3502_v58 }
 0x30a   :  { %v3509_v0 = vadd.f32 %v2600_v63, %v3331_v18  ;;  %v1476_v2 = vpop.f32.mrb[77].mxu0  ;;  %1637 = vmax.xlane.f32.xlu1 %v3505_v61 }
 0x30b   :  { %v2601_v5 = vpop.f32.mrb[78].mxu0  ;;  %v3518_v16 = vadd.f32 %v3331_v18, %v1476_v2 }
 0x30c   :  { %v3513_v8 = vadd.f32 %v2601_v5, %v3331_v18  ;;  %v1479_v10 = vpop.f32.mrb[79].mxu0 }
 0x30d   :  { %1647 = vmax.xlane.f32.xlu0 %v3509_v0  ;;  %v3521_v21 = vadd.f32 %v3331_v18, %v1479_v10 }
 0x30e   :  { %1649 = vmax.xlane.f32.xlu1 %v3513_v8 }
 0x311   :  { %v2604_v23 = vpop.f32.mrb[80].mxu0  ;;  %1643 = vmax.xlane.f32.xlu0 %v3518_v16 }
 0x312   :  { %v3525_v26 = vadd.f32 %v2604_v23, %v3331_v18  ;;  %v1492_v29 = vpop.f32.mrb[81].mxu0  ;;  %1645 = vmax.xlane.f32.xlu1 %v3521_v21 }
 0x313   :  { %v2605_v36 = vpop.f32.mrb[82].mxu0  ;;  %v3534_v48 = vadd.f32 %v3331_v18, %v1492_v29 }
 0x314   :  { %v3529_v41 = vadd.f32 %v2605_v36, %v3331_v18  ;;  %v1495_v49 = vpop.f32.mrb[83].mxu0 }
 0x315   :  { %1655 = vmax.xlane.f32.xlu0 %v3525_v26  ;;  %4133 = vst [vmem:[#allocation2_spill] sm:$0xff] %v3534_v48  ;;  %v3537_v44 = vadd.f32 %v3331_v18, %v1495_v49 }
 0x316   :  { %1657 = vmax.xlane.f32.xlu1 %v3529_v41 }
 0x317   :  { %4134 = vst [vmem:[#allocation3_spill] sm:$0xff] %v3537_v44 }
 0x319   :  { %v2608_v39 = vpop.f32.mrb[84].mxu0  ;;  %1651 = vmax.xlane.f32.xlu0 %v3534_v48 }
 0x31a   :  { %v3541_v53 = vadd.f32 %v2608_v39, %v3331_v18  ;;  %v1508_v56 = vpop.f32.mrb[85].mxu0  ;;  %1653 = vmax.xlane.f32.xlu1 %v3537_v44 }
 0x31b   :  { %v2609_v63 = vpop.f32.mrb[86].mxu0  ;;  %v3550_v10 = vadd.f32 %v3331_v18, %v1508_v56 }
 0x31c   :  { %4135 = vst [vmem:[#allocation4_spill] sm:$0xff] %v3541_v53  ;;  %v3545_v2 = vadd.f32 %v2609_v63, %v3331_v18  ;;  %v1511_v5 = vpop.f32.mrb[87].mxu0 }
 0x31d   :  { %1663 = vmax.xlane.f32.xlu0 %v3541_v53  ;;  %4137 = vst [vmem:[#allocation6_spill] sm:$0xff] %v3550_v10  ;;  %v3553_v23 = vadd.f32 %v3331_v18, %v1511_v5 }
 0x31e   :  { %4136 = vst [vmem:[#allocation5_spill] sm:$0xff] %v3545_v2  ;;  %1665 = vmax.xlane.f32.xlu1 %v3545_v2 }
 0x31f   :  { %4138 = vst [vmem:[#allocation7_spill] sm:$0xff] %v3553_v23 }
 0x321   :  { %v2612_v29 = vpop.f32.mrb[88].mxu0  ;;  %1659 = vmax.xlane.f32.xlu0 %v3550_v10 }
 0x322   :  { %v3557_v36 = vadd.f32 %v2612_v29, %v3331_v18  ;;  %v1524_v49 = vpop.f32.mrb[89].mxu0  ;;  %1661 = vmax.xlane.f32.xlu1 %v3553_v23 }
 0x323   :  { %v2613_v39 = vpop.f32.mrb[90].mxu0  ;;  %v3566_v56 = vadd.f32 %v3331_v18, %v1524_v49 }
 0x324   :  { %4139 = vst [vmem:[#allocation8_spill] sm:$0xff] %v3557_v36  ;;  %v3561_v63 = vadd.f32 %v2613_v39, %v3331_v18  ;;  %v1527_v2 = vpop.f32.mrb[91].mxu0 }
 0x325   :  { %1671 = vmax.xlane.f32.xlu0 %v3557_v36  ;;  %4141 = vst [vmem:[#allocation10_spill] sm:$0xff] %v3566_v56  ;;  %v3569_v5 = vadd.f32 %v3331_v18, %v1527_v2 }
 0x326   :  { %4140 = vst [vmem:[#allocation9_spill] sm:$0xff] %v3561_v63  ;;  %1673 = vmax.xlane.f32.xlu1 %v3561_v63 }
 0x327   :  { %4142 = vst [vmem:[#allocation11_spill] sm:$0xff] %v3569_v5 }
 0x329   :  { %v2616_v29 = vpop.f32.mrb[92].mxu0  ;;  %1667 = vmax.xlane.f32.xlu0 %v3566_v56 }
 0x32a   :  { %v3573_v23 = vadd.f32 %v2616_v29, %v3331_v18  ;;  %v1540_v10 = vpop.f32.mrb[93].mxu0  ;;  %1669 = vmax.xlane.f32.xlu1 %v3569_v5 }
 0x32b   :  { %v2617_v39 = vpop.f32.mrb[94].mxu0  ;;  %v3582_v2 = vadd.f32 %v3331_v18, %v1540_v10 }
 0x32c   :  { %4143 = vst [vmem:[#allocation12_spill] sm:$0xff] %v3573_v23  ;;  %v3577_v36 = vadd.f32 %v2617_v39, %v3331_v18  ;;  %v1543_v63 = vpop.f32.mrb[95].mxu0 }
 0x32d   :  { %1679 = vmax.xlane.f32.xlu0 %v3573_v23  ;;  %4145 = vst [vmem:[#allocation14_spill] sm:$0xff] %v3582_v2  ;;  %v3585_v49 = vadd.f32 %v3331_v18, %v1543_v63 }
 0x32e   :  { %4144 = vst [vmem:[#allocation13_spill] sm:$0xff] %v3577_v36  ;;  %1681 = vmax.xlane.f32.xlu1 %v3577_v36 }
 0x32f   :  { %4146 = vst [vmem:[#allocation15_spill] sm:$0xff] %v3585_v49 }
 0x331   :  { %1675 = vmax.xlane.f32.xlu0 %v3582_v2 }
 0x332   :  { %1677 = vmax.xlane.f32.xlu1 %v3585_v49 }
 0x341   :  { %v1560_v29 = vpop.xlane.xlu1 %1559 }
 0x342   :  { %v1685_v5 = vsub.f32 %v3334_v20, %v1560_v29  ;;  %v1556_v39 = vpop.xlane.xlu0 %1555 }
 0x343   :  { %v1683_v56 = vsub.f32 %v3337_v12, %v1556_v39 }
 0x344   :  { %v1751_v53 = vmul.f32 1.442695, %v1685_v5 }
 0x345   :  { %v1747_v23 = vmul.f32 1.442695, %v1683_v56  ;;  %v1562_v44 = vpop.xlane.xlu1 %1561 }
 0x346   :  { %2690 = vpow2.f32 %v1751_v53  ;;  %v1686_v10 = vsub.f32 %v3342_v24, %v1562_v44  ;;  %v1558_v36 = vpop.xlane.xlu0 %1557 }
 0x347   :  { %v1684_v18 = vsub.f32 %v3345_v25, %v1558_v36  ;;  %2692 = vpow2.f32 %v1747_v23 }
 0x348   :  { %v1753_v63 = vmul.f32 1.442695, %v1686_v10 }
 0x349   :  { %v1749_v2 = vmul.f32 1.442695, %v1684_v18 }
 0x34a   :  { %2694 = vpow2.f32 %v1753_v63  ;;  %v1568_v49 = vpop.xlane.xlu0 %1567 }
 0x34b   :  { %v1689_v48 = vsub.f32 %v3350_v27, %v1568_v49  ;;  %v1570_v20 = vpop.xlane.xlu1 %1569  ;;  %2696 = vpow2.f32 %v1749_v2 }
 0x34c   :  { %v1690_v29 = vsub.f32 %v3353_v30, %v1570_v20 }
 0x34d   :  { %v1759_v12 = vmul.f32 1.442695, %v1689_v48 }
 0x34e   :  { %v1761_v56 = vmul.f32 1.442695, %v1690_v29  ;;  %v1564_v5 = vpop.xlane.xlu0 %1563 }
 0x34f   :  { %2698 = vpow2.f32 %v1759_v12  ;;  %v1687_v24 = vsub.f32 %v3358_v32, %v1564_v5  ;;  %v1566_v44 = vpop.xlane.xlu1 %1565 }
 0x350   :  { %v3596_v53 = vpop.eup %2690  ;;  %v1688_v25 = vsub.f32 %v3361_v33, %v1566_v44  ;;  %2700 = vpow2.f32 %v1761_v56 }
 0x351   :  { %v1755_v23 = vmul.f32 1.442695, %v1687_v24  ;;  %1879 = vadd.xlane.f32.xlu0 %v3596_v53  ;;  %v3600_v49 = vpop.eup %2692 }
 0x352   :  { %v1757_v27 = vmul.f32 1.442695, %v1688_v25  ;;  %v1576_v36 = vpop.xlane.xlu0 %1575 }
 0x353   :  { %2702 = vpow2.f32 %v1755_v23  ;;  %v1693_v30 = vsub.f32 %v3365_v35, %v1576_v36  ;;  %v1578_v48 = vpop.xlane.xlu1 %1577 }
 0x354   :  { %v3603_v2 = vpop.eup %2694  ;;  %v1694_v32 = vsub.f32 %v3369_v38, %v1578_v48  ;;  %2704 = vpow2.f32 %v1757_v27 }
 0x355   :  { %v1767_v39 = vmul.f32 1.442695, %v1693_v30  ;;  %1881 = vadd.xlane.f32.xlu1 %v3603_v2  ;;  %1875 = vadd.xlane.f32.xlu0 %v3600_v49  ;;  %v3609_v20 = vpop.eup %2696 }
 0x356   :  { %v1769_v33 = vmul.f32 1.442695, %v1694_v32  ;;  %v1572_v10 = vpop.xlane.xlu0 %1571 }
 0x357   :  { %2706 = vpow2.f32 %v1767_v39  ;;  %v1691_v18 = vsub.f32 %v3374_v43, %v1572_v10  ;;  %v1574_v63 = vpop.xlane.xlu1 %1573 }
 0x358   :  { %v1692_v35 = vsub.f32 %v3377_v47, %v1574_v63  ;;  %2708 = vpow2.f32 %v1769_v33 }
 0x359   :  { %v3612_v29 = vpop.eup %2698  ;;  %v1763_v12 = vmul.f32 1.442695, %v1691_v18  ;;  %1877 = vadd.xlane.f32.xlu1 %v3609_v20 }
 0x35a   :  { %v1765_v38 = vmul.f32 1.442695, %v1692_v35  ;;  %1887 = vadd.xlane.f32.xlu0 %v3612_v29  ;;  %v1584_v56 = vpop.xlane.xlu0 %1583  ;;  %v3617_v43 = vpop.eup %2700 }
 0x35b   :  { %2710 = vpow2.f32 %v1763_v12  ;;  %v1697_v5 = vsub.f32 %v3381_v50, %v1584_v56  ;;  %v1586_v24 = vpop.xlane.xlu1 %1585 }
 0x35c   :  { %v1698_v44 = vsub.f32 %v3385_v15, %v1586_v24  ;;  %2712 = vpow2.f32 %v1765_v38 }
 0x35d   :  { %v3620_v25 = vpop.eup %2702  ;;  %v1775_v47 = vmul.f32 1.442695, %v1697_v5  ;;  %1889 = vadd.xlane.f32.xlu1 %v3617_v43 }
 0x35e   :  { %v1777_v23 = vmul.f32 1.442695, %v1698_v44  ;;  %1883 = vadd.xlane.f32.xlu0 %v3620_v25  ;;  %v1580_v27 = vpop.xlane.xlu0 %1579  ;;  %v3625_v50 = vpop.eup %2704 }
 0x35f   :  { %2714 = vpow2.f32 %v1775_v47  ;;  %v1695_v36 = vsub.f32 %v3390_v45, %v1580_v27  ;;  %v1582_v30 = vpop.xlane.xlu1 %1581 }
 0x360   :  { %v1696_v48 = vsub.f32 %v3393_v9, %v1582_v30  ;;  %2716 = vpow2.f32 %v1777_v23 }
 0x361   :  { %v3628_v32 = vpop.eup %2706  ;;  %v1771_v15 = vmul.f32 1.442695, %v1695_v36  ;;  %1885 = vadd.xlane.f32.xlu1 %v3625_v50 }
 0x362   :  { %v1773_v39 = vmul.f32 1.442695, %v1696_v48  ;;  %1895 = vadd.xlane.f32.xlu0 %v3628_v32  ;;  %v1592_v33 = vpop.xlane.xlu0 %1591  ;;  %v3633_v45 = vpop.eup %2708 }
 0x363   :  { %2718 = vpow2.f32 %v1771_v15  ;;  %v1701_v10 = vsub.f32 %v3397_v40, %v1592_v33  ;;  %v1594_v18 = vpop.xlane.xlu1 %1593 }
 0x364   :  { %v1702_v63 = vsub.f32 %v3401_v11, %v1594_v18  ;;  %2720 = vpow2.f32 %v1773_v39 }
 0x365   :  { %v3636_v35 = vpop.eup %2710  ;;  %v1783_v9 = vmul.f32 1.442695, %v1701_v10  ;;  %1897 = vadd.xlane.f32.xlu1 %v3633_v45 }
 0x366   :  { %v1785_v12 = vmul.f32 1.442695, %v1702_v63  ;;  %1891 = vadd.xlane.f32.xlu0 %v3636_v35  ;;  %v1588_v38 = vpop.xlane.xlu0 %1587  ;;  %v3641_v40 = vpop.eup %2712 }
 0x367   :  { %2722 = vpow2.f32 %v1783_v9  ;;  %v1699_v56 = vsub.f32 %v3406_v46, %v1588_v38  ;;  %v1590_v5 = vpop.xlane.xlu1 %1589 }
 0x368   :  { %v1700_v24 = vsub.f32 %v3409_v52, %v1590_v5  ;;  %2724 = vpow2.f32 %v1785_v12 }
 0x369   :  { %v3644_v44 = vpop.eup %2714  ;;  %v1779_v11 = vmul.f32 1.442695, %v1699_v56  ;;  %1893 = vadd.xlane.f32.xlu1 %v3641_v40 }
 0x36a   :  { %v1781_v47 = vmul.f32 1.442695, %v1700_v24  ;;  %1903 = vadd.xlane.f32.xlu0 %v3644_v44  ;;  %v1600_v23 = vpop.xlane.xlu0 %1599  ;;  %v3649_v46 = vpop.eup %2716 }
 0x36b   :  { %2726 = vpow2.f32 %v1779_v11  ;;  %v1705_v27 = vsub.f32 %v3413_v54, %v1600_v23  ;;  %v1602_v36 = vpop.xlane.xlu1 %1601 }
 0x36c   :  { %v1706_v30 = vsub.f32 %v3417_v57, %v1602_v36  ;;  %2728 = vpow2.f32 %v1781_v47 }
 0x36d   :  { %v3652_v48 = vpop.eup %2718  ;;  %v1791_v52 = vmul.f32 1.442695, %v1705_v27  ;;  %1905 = vadd.xlane.f32.xlu1 %v3649_v46 }
 0x36e   :  { %v1793_v15 = vmul.f32 1.442695, %v1706_v30  ;;  %1899 = vadd.xlane.f32.xlu0 %v3652_v48  ;;  %v1596_v39 = vpop.xlane.xlu0 %1595  ;;  %v3657_v54 = vpop.eup %2720 }
 0x36f   :  { %2730 = vpow2.f32 %v1791_v52  ;;  %v1703_v33 = vsub.f32 %v3422_v59, %v1596_v39  ;;  %v1598_v10 = vpop.xlane.xlu1 %1597 }
 0x370   :  { %v1704_v18 = vsub.f32 %v3425_v60, %v1598_v10  ;;  %2732 = vpow2.f32 %v1793_v15 }
 0x371   :  { %v3660_v63 = vpop.eup %2722  ;;  %v1787_v57 = vmul.f32 1.442695, %v1703_v33  ;;  %1901 = vadd.xlane.f32.xlu1 %v3657_v54 }
 0x372   :  { %v1789_v9 = vmul.f32 1.442695, %v1704_v18  ;;  %1911 = vadd.xlane.f32.xlu0 %v3660_v63  ;;  %v1608_v12 = vpop.xlane.xlu0 %1607  ;;  %v3665_v59 = vpop.eup %2724 }
 0x373   :  { %2734 = vpow2.f32 %v1787_v57  ;;  %v1709_v38 = vsub.f32 %v3429_v62, %v1608_v12  ;;  %v1610_v56 = vpop.xlane.xlu1 %1609 }
 0x374   :  { %v1710_v5 = vsub.f32 %v3433_v1, %v1610_v56  ;;  %2736 = vpow2.f32 %v1789_v9 }
 0x375   :  { %v3668_v24 = vpop.eup %2726  ;;  %v1799_v60 = vmul.f32 1.442695, %v1709_v38  ;;  %1913 = vadd.xlane.f32.xlu1 %v3665_v59 }
 0x376   :  { %v1801_v11 = vmul.f32 1.442695, %v1710_v5  ;;  %1907 = vadd.xlane.f32.xlu0 %v3668_v24  ;;  %v1604_v47 = vpop.xlane.xlu0 %1603  ;;  %v3673_v62 = vpop.eup %2728 }
 0x377   :  { %2738 = vpow2.f32 %v1799_v60  ;;  %v1707_v23 = vsub.f32 %v3438_v3, %v1604_v47  ;;  %v1606_v27 = vpop.xlane.xlu1 %1605 }
 0x378   :  { %v1708_v36 = vsub.f32 %v3441_v4, %v1606_v27  ;;  %2740 = vpow2.f32 %v1801_v11 }
 0x379   :  { %v3676_v30 = vpop.eup %2730  ;;  %v1795_v1 = vmul.f32 1.442695, %v1707_v23  ;;  %1909 = vadd.xlane.f32.xlu1 %v3673_v62 }
 0x37a   :  { %v1797_v52 = vmul.f32 1.442695, %v1708_v36  ;;  %1919 = vadd.xlane.f32.xlu0 %v3676_v30  ;;  %v1616_v15 = vpop.xlane.xlu0 %1615  ;;  %v3681_v3 = vpop.eup %2732 }
 0x37b   :  { %2742 = vpow2.f32 %v1795_v1  ;;  %v1713_v39 = vsub.f32 %v3445_v6, %v1616_v15  ;;  %v1618_v33 = vpop.xlane.xlu1 %1617 }
 0x37c   :  { %v1714_v10 = vsub.f32 %v3449_v14, %v1618_v33  ;;  %2744 = vpow2.f32 %v1797_v52 }
 0x37d   :  { %v3684_v18 = vpop.eup %2734  ;;  %v1807_v4 = vmul.f32 1.442695, %v1713_v39  ;;  %1921 = vadd.xlane.f32.xlu1 %v3681_v3 }
 0x37e   :  { %v1809_v57 = vmul.f32 1.442695, %v1714_v10  ;;  %1915 = vadd.xlane.f32.xlu0 %v3684_v18  ;;  %v1612_v9 = vpop.xlane.xlu0 %1611  ;;  %v3689_v6 = vpop.eup %2736 }
 0x37f   :  { %2746 = vpow2.f32 %v1807_v4  ;;  %v1711_v12 = vsub.f32 %v3454_v17, %v1612_v9  ;;  %v1614_v38 = vpop.xlane.xlu1 %1613 }
 0x380   :  { %v1712_v56 = vsub.f32 %v3457_v19, %v1614_v38  ;;  %2748 = vpow2.f32 %v1809_v57 }
 0x381   :  { %v3692_v5 = vpop.eup %2738  ;;  %v1803_v14 = vmul.f32 1.442695, %v1711_v12  ;;  %1917 = vadd.xlane.f32.xlu1 %v3689_v6 }
 0x382   :  { %v1805_v60 = vmul.f32 1.442695, %v1712_v56  ;;  %1927 = vadd.xlane.f32.xlu0 %v3692_v5  ;;  %v1624_v11 = vpop.xlane.xlu0 %1623  ;;  %v3697_v17 = vpop.eup %2740 }
 0x383   :  { %2750 = vpow2.f32 %v1803_v14  ;;  %v1717_v47 = vsub.f32 %v3461_v22, %v1624_v11  ;;  %v1626_v23 = vpop.xlane.xlu1 %1625 }
 0x384   :  { %v1718_v27 = vsub.f32 %v3465_v28, %v1626_v23  ;;  %2752 = vpow2.f32 %v1805_v60 }
 0x385   :  { %v3700_v36 = vpop.eup %2742  ;;  %v1815_v19 = vmul.f32 1.442695, %v1717_v47  ;;  %1929 = vadd.xlane.f32.xlu1 %v3697_v17 }
 0x386   :  { %v1817_v1 = vmul.f32 1.442695, %v1718_v27  ;;  %1923 = vadd.xlane.f32.xlu0 %v3700_v36  ;;  %v1620_v52 = vpop.xlane.xlu0 %1619  ;;  %v3705_v22 = vpop.eup %2744 }
 0x387   :  { %2754 = vpow2.f32 %v1815_v19  ;;  %v1715_v15 = vsub.f32 %v3470_v31, %v1620_v52  ;;  %v1622_v39 = vpop.xlane.xlu1 %1621 }
 0x388   :  { %v1716_v33 = vsub.f32 %v3473_v34, %v1622_v39  ;;  %2756 = vpow2.f32 %v1817_v1 }
 0x389   :  { %v3708_v10 = vpop.eup %2746  ;;  %v1811_v28 = vmul.f32 1.442695, %v1715_v15  ;;  %1925 = vadd.xlane.f32.xlu1 %v3705_v22 }
 0x38a   :  { %v1813_v4 = vmul.f32 1.442695, %v1716_v33  ;;  %1935 = vadd.xlane.f32.xlu0 %v3708_v10  ;;  %v1632_v57 = vpop.xlane.xlu0 %1631  ;;  %v3713_v31 = vpop.eup %2748 }
 0x38b   :  { %2758 = vpow2.f32 %v1811_v28  ;;  %v1721_v9 = vsub.f32 %v3477_v37, %v1632_v57  ;;  %v1634_v12 = vpop.xlane.xlu1 %1633 }
 0x38c   :  { %v1722_v38 = vsub.f32 %v3481_v51, %v1634_v12  ;;  %2760 = vpow2.f32 %v1813_v4 }
 0x38d   :  { %v3716_v56 = vpop.eup %2750  ;;  %v1823_v34 = vmul.f32 1.442695, %v1721_v9  ;;  %1937 = vadd.xlane.f32.xlu1 %v3713_v31 }
 0x38e   :  { %v1825_v14 = vmul.f32 1.442695, %v1722_v38  ;;  %1931 = vadd.xlane.f32.xlu0 %v3716_v56  ;;  %v1628_v60 = vpop.xlane.xlu0 %1627  ;;  %v3721_v37 = vpop.eup %2752 }
 0x38f   :  { %2762 = vpow2.f32 %v1823_v34  ;;  %v1719_v11 = vsub.f32 %v3486_v42, %v1628_v60  ;;  %v1630_v47 = vpop.xlane.xlu1 %1629 }
 0x390   :  { %v1720_v23 = vsub.f32 %v3489_v13, %v1630_v47  ;;  %2764 = vpow2.f32 %v1825_v14 }
 0x391   :  { %v3724_v27 = vpop.eup %2754  ;;  %v1819_v51 = vmul.f32 1.442695, %v1719_v11  ;;  %1933 = vadd.xlane.f32.xlu1 %v3721_v37 }
 0x392   :  { %v1821_v19 = vmul.f32 1.442695, %v1720_v23  ;;  %1943 = vadd.xlane.f32.xlu0 %v3724_v27  ;;  %v1640_v1 = vpop.xlane.xlu0 %1639  ;;  %v3729_v42 = vpop.eup %2756 }
 0x393   :  { %2766 = vpow2.f32 %v1819_v51  ;;  %v1725_v52 = vsub.f32 %v3493_v7, %v1640_v1  ;;  %v1642_v15 = vpop.xlane.xlu1 %1641 }
 0x394   :  { %v1726_v39 = vsub.f32 %v3497_v55, %v1642_v15  ;;  %2768 = vpow2.f32 %v1821_v19 }
 0x395   :  { %v3732_v33 = vpop.eup %2758  ;;  %v1831_v13 = vmul.f32 1.442695, %v1725_v52  ;;  %1945 = vadd.xlane.f32.xlu1 %v3729_v42 }
 0x396   :  { %v1833_v28 = vmul.f32 1.442695, %v1726_v39  ;;  %1939 = vadd.xlane.f32.xlu0 %v3732_v33  ;;  %v1636_v4 = vpop.xlane.xlu0 %1635  ;;  %v3737_v7 = vpop.eup %2760 }
 0x397   :  { %2770 = vpow2.f32 %v1831_v13  ;;  %v1723_v57 = vsub.f32 %v3502_v58, %v1636_v4  ;;  %v1638_v9 = vpop.xlane.xlu1 %1637 }
 0x398   :  { %v1724_v12 = vsub.f32 %v3505_v61, %v1638_v9  ;;  %2772 = vpow2.f32 %v1833_v28 }
 0x399   :  { %v3740_v38 = vpop.eup %2762  ;;  %v1827_v55 = vmul.f32 1.442695, %v1723_v57  ;;  %1941 = vadd.xlane.f32.xlu1 %v3737_v7 }
 0x39a   :  { %v1829_v34 = vmul.f32 1.442695, %v1724_v12  ;;  %1951 = vadd.xlane.f32.xlu0 %v3740_v38  ;;  %v1648_v14 = vpop.xlane.xlu0 %1647  ;;  %v3745_v58 = vpop.eup %2764 }
 0x39b   :  { %2774 = vpow2.f32 %v1827_v55  ;;  %v1729_v60 = vsub.f32 %v3509_v0, %v1648_v14  ;;  %v1650_v11 = vpop.xlane.xlu1 %1649  ;;  %v4147_v14 = vld [vmem:[#allocation2_spill] sm:$0xff] }
 0x39c   :  { %v1730_v47 = vsub.f32 %v3513_v8, %v1650_v11  ;;  %2776 = vpow2.f32 %v1829_v34 }
 0x39d   :  { %v3748_v23 = vpop.eup %2766  ;;  %v1839_v61 = vmul.f32 1.442695, %v1729_v60  ;;  %1953 = vadd.xlane.f32.xlu1 %v3745_v58 }
 0x39e   :  { %v1841_v51 = vmul.f32 1.442695, %v1730_v47  ;;  %1947 = vadd.xlane.f32.xlu0 %v3748_v23  ;;  %v1644_v19 = vpop.xlane.xlu0 %1643  ;;  %v3753_v0 = vpop.eup %2768  ;;  %v4148_v47 = vld [vmem:[#allocation3_spill] sm:$0xff] }
 0x39f   :  { %2778 = vpow2.f32 %v1839_v61  ;;  %v1727_v1 = vsub.f32 %v3518_v16, %v1644_v19  ;;  %v1646_v52 = vpop.xlane.xlu1 %1645 }
 0x3a0   :  { %v1728_v15 = vsub.f32 %v3521_v21, %v1646_v52  ;;  %2780 = vpow2.f32 %v1841_v51  ;;  %v4149_v52 = vld [vmem:[#allocation4_spill] sm:$0xff] }
 0x3a1   :  { %v3756_v39 = vpop.eup %2770  ;;  %v1835_v8 = vmul.f32 1.442695, %v1727_v1  ;;  %1949 = vadd.xlane.f32.xlu1 %v3753_v0 }
 0x3a2   :  { %v1837_v13 = vmul.f32 1.442695, %v1728_v15  ;;  %1959 = vadd.xlane.f32.xlu0 %v3756_v39  ;;  %v1656_v28 = vpop.xlane.xlu0 %1655  ;;  %v3761_v16 = vpop.eup %2772 }
 0x3a3   :  { %2782 = vpow2.f32 %v1835_v8  ;;  %v1733_v4 = vsub.f32 %v3525_v26, %v1656_v28  ;;  %v1658_v57 = vpop.xlane.xlu1 %1657  ;;  %v4150_v28 = vld [vmem:[#allocation5_spill] sm:$0xff] }
 0x3a4   :  { %v1734_v9 = vsub.f32 %v3529_v41, %v1658_v57  ;;  %2784 = vpow2.f32 %v1837_v13 }
 0x3a5   :  { %v3764_v12 = vpop.eup %2774  ;;  %v1847_v21 = vmul.f32 1.442695, %v1733_v4  ;;  %1961 = vadd.xlane.f32.xlu1 %v3761_v16 }
 0x3a6   :  { %v1849_v55 = vmul.f32 1.442695, %v1734_v9  ;;  %1955 = vadd.xlane.f32.xlu0 %v3764_v12  ;;  %v1652_v34 = vpop.xlane.xlu0 %1651  ;;  %v3769_v26 = vpop.eup %2776 }
 0x3a7   :  { %2786 = vpow2.f32 %v1847_v21  ;;  %v1731_v60 = vsub.f32 %v4147_v14, %v1652_v34  ;;  %v1654_v11 = vpop.xlane.xlu1 %1653  ;;  %v4152_v34 = vld [vmem:[#allocation6_spill] sm:$0xff] }
 0x3a8   :  { %v1732_v61 = vsub.f32 %v4148_v47, %v1654_v11  ;;  %2788 = vpow2.f32 %v1849_v55  ;;  %v4154_v47 = vld [vmem:[#allocation7_spill] sm:$0xff] }
 0x3a9   :  { %v3772_v51 = vpop.eup %2778  ;;  %v1843_v41 = vmul.f32 1.442695, %v1731_v60  ;;  %1957 = vadd.xlane.f32.xlu1 %v3769_v26 }
 0x3aa   :  { %v1845_v19 = vmul.f32 1.442695, %v1732_v61  ;;  %1967 = vadd.xlane.f32.xlu0 %v3772_v51  ;;  %v1664_v1 = vpop.xlane.xlu0 %1663  ;;  %v3777_v13 = vpop.eup %2780 }
 0x3ab   :  { %2790 = vpow2.f32 %v1843_v41  ;;  %v1737_v15 = vsub.f32 %v4149_v52, %v1664_v1  ;;  %v1666_v8 = vpop.xlane.xlu1 %1665 }
 0x3ac   :  { %v1738_v4 = vsub.f32 %v4150_v28, %v1666_v8  ;;  %2792 = vpow2.f32 %v1845_v19 }
 0x3ad   :  { %v3780_v57 = vpop.eup %2782  ;;  %v1855_v9 = vmul.f32 1.442695, %v1737_v15  ;;  %1969 = vadd.xlane.f32.xlu1 %v3777_v13  ;;  %v4156_v15 = vld [vmem:[#allocation8_spill] sm:$0xff] }
 0x3ae   :  { %4151 = vst [vmem:[#allocation2_spill] sm:$0xff] %v3780_v57  ;;  %v1857_v21 = vmul.f32 1.442695, %v1738_v4  ;;  %1963 = vadd.xlane.f32.xlu0 %v3780_v57  ;;  %v1660_v55 = vpop.xlane.xlu0 %1659  ;;  %v3785_v11 = vpop.eup %2784 }
 0x3af   :  { %2794 = vpow2.f32 %v1855_v9  ;;  %v1735_v14 = vsub.f32 %v4152_v34, %v1660_v55  ;;  %v1662_v60 = vpop.xlane.xlu1 %1661  ;;  %4153 = vst [vmem:[#allocation3_spill] sm:$0xff] %v3785_v11  ;;  %v4158_v9 = vld [vmem:[#allocation9_spill] sm:$0xff] }
 0x3b0   :  { %v1736_v61 = vsub.f32 %v4154_v47, %v1662_v60  ;;  %2796 = vpow2.f32 %v1857_v21  ;;  %v4160_v47 = vld [vmem:[#allocation10_spill] sm:$0xff] }
 0x3b1   :  { %v3788_v41 = vpop.eup %2786  ;;  %v1851_v1 = vmul.f32 1.442695, %v1735_v14  ;;  %1965 = vadd.xlane.f32.xlu1 %v3785_v11 }
 0x3b2   :  { %4155 = vst [vmem:[#allocation4_spill] sm:$0xff] %v3788_v41  ;;  %v1853_v52 = vmul.f32 1.442695, %v1736_v61  ;;  %1975 = vadd.xlane.f32.xlu0 %v3788_v41  ;;  %v1672_v19 = vpop.xlane.xlu0 %1671  ;;  %v3793_v4 = vpop.eup %2788 }
 0x3b3   :  { %2798 = vpow2.f32 %v1851_v1  ;;  %v1741_v8 = vsub.f32 %v4156_v15, %v1672_v19  ;;  %v1674_v28 = vpop.xlane.xlu1 %1673  ;;  %4157 = vst [vmem:[#allocation5_spill] sm:$0xff] %v3793_v4  ;;  %v4162_v15 = vld [vmem:[#allocation11_spill] sm:$0xff] }
 0x3b4   :  { %v1742_v55 = vsub.f32 %v4158_v9, %v1674_v28  ;;  %2800 = vpow2.f32 %v1853_v52 }
 0x3b5   :  { %v3796_v34 = vpop.eup %2790  ;;  %v1863_v60 = vmul.f32 1.442695, %v1741_v8  ;;  %1977 = vadd.xlane.f32.xlu1 %v3793_v4 }
 0x3b6   :  { %4159 = vst [vmem:[#allocation6_spill] sm:$0xff] %v3796_v34  ;;  %v1865_v14 = vmul.f32 1.442695, %v1742_v55  ;;  %1971 = vadd.xlane.f32.xlu0 %v3796_v34  ;;  %v1668_v21 = vpop.xlane.xlu0 %1667  ;;  %v3801_v19 = vpop.eup %2792 }
 0x3b7   :  { %2802 = vpow2.f32 %v1863_v60  ;;  %v1739_v61 = vsub.f32 %v4160_v47, %v1668_v21  ;;  %v1670_v1 = vpop.xlane.xlu1 %1669  ;;  %4161 = vst [vmem:[#allocation7_spill] sm:$0xff] %v3801_v19  ;;  %v4165_v47 = vld [vmem:[#allocation12_spill] sm:$0xff] }
 0x3b8   :  { %v1740_v41 = vsub.f32 %v4162_v15, %v1670_v1  ;;  %2804 = vpow2.f32 %v1865_v14  ;;  %v4166_v1 = vld [vmem:[#allocation14_spill] sm:$0xff] }
 0x3b9   :  { %v3804_v11 = vpop.eup %2794  ;;  %v1859_v28 = vmul.f32 1.442695, %v1739_v61  ;;  %1973 = vadd.xlane.f32.xlu1 %v3801_v19  ;;  %v4168_v19 = vld [vmem:[#allocation15_spill] sm:$0xff] }
 0x3ba   :  { %4163 = vst [vmem:[#allocation8_spill] sm:$0xff] %v3804_v11  ;;  %v1861_v8 = vmul.f32 1.442695, %v1740_v41  ;;  %1983 = vadd.xlane.f32.xlu0 %v3804_v11  ;;  %v1680_v52 = vpop.xlane.xlu0 %1679  ;;  %v3808_v55 = vpop.eup %2796  ;;  %v4167_v11 = vld [vmem:[#allocation13_spill] sm:$0xff] }
 0x3bb   :  { %2806 = vpow2.f32 %v1859_v28  ;;  %v1682_v9 = vpop.xlane.xlu1 %1681  ;;  %v1745_v61 = vsub.f32 %v4165_v47, %v1680_v52 }
 0x3bc   :  { %2808 = vpow2.f32 %v1861_v8  ;;  %v1746_v28 = vsub.f32 %v4167_v11, %v1682_v9 }
 0x3bd   :  { %v3810_v60 = vpop.eup %2798  ;;  %1985 = vadd.xlane.f32.xlu1 %v3808_v55 }
 0x3be   :  { %4164 = vst [vmem:[#allocation9_spill] sm:$0xff] %v3810_v60  ;;  %1979 = vadd.xlane.f32.xlu0 %v3810_v60  ;;  %v1676_v21 = vpop.xlane.xlu0 %1675  ;;  %v3816_v15 = vpop.eup %2800  ;;  %v1871_v60 = vmul.f32 1.442695, %v1745_v61 }
 0x3bf   :  { %v1743_v14 = vsub.f32 %v4166_v1, %v1676_v21  ;;  %v1678_v41 = vpop.xlane.xlu1 %1677  ;;  %v1873_v21 = vmul.f32 1.442695, %v1746_v28 }
 0x3c0   :  { %v1744_v34 = vsub.f32 %v4168_v19, %v1678_v41 }
 0x3c1   :  { %v3820_v4 = vpop.eup %2802  ;;  %v1867_v57 = vmul.f32 1.442695, %v1743_v14  ;;  %1981 = vadd.xlane.f32.xlu1 %v3816_v15 }
 0x3c2   :  { %v1869_v8 = vmul.f32 1.442695, %v1744_v34  ;;  %1991 = vadd.xlane.f32.xlu0 %v3820_v4  ;;  %v3824_v52 = vpop.eup %2804 }
 0x3c3   :  { %2810 = vpow2.f32 %v1867_v57 }
 0x3c4   :  { %2812 = vpow2.f32 %v1869_v8 }
 0x3c5   :  { %v3826_v47 = vpop.eup %2806  ;;  %1993 = vadd.xlane.f32.xlu1 %v3824_v52  ;;  %2814 = vpow2.f32 %v1871_v60 }
 0x3c6   :  { %1987 = vadd.xlane.f32.xlu0 %v3826_v47  ;;  %v3830_v11 = vpop.eup %2808  ;;  %2816 = vpow2.f32 %v1873_v21 }
 0x3c9   :  { %1989 = vadd.xlane.f32.xlu1 %v3830_v11 }
 0x3cd   :  { %v3833_v34 = vpop.eup %2810 }
 0x3ce   :  { %v3835_v19 = vpop.eup %2812  ;;  %1995 = vadd.xlane.f32.xlu0 %v3833_v34 }
 0x3cf   :  { %4169 = vst [vmem:[#allocation10_spill] sm:$0xff] %v3835_v19  ;;  %1997 = vadd.xlane.f32.xlu1 %v3835_v19  ;;  %v3839_v57 = vpop.eup %2814 }
 0x3d0   :  { %v3841_v9 = vpop.eup %2816 }
 0x3d1   :  { %4170 = vst [vmem:[#allocation11_spill] sm:$0xff] %v3841_v9 }
 0x3d2   :  { %1999 = vadd.xlane.f32.xlu0 %v3839_v57 }
 0x3d3   :  { %2001 = vadd.xlane.f32.xlu1 %v3841_v9 }
 0x3de   :  { %v1880_v60 = vpop.xlane.xlu0 %1879 }
 0x3df   :  { %2818 = vrcp.f32 %v1880_v60 }
 0x3e2   :  { %v1882_v61 = vpop.xlane.xlu1 %1881  ;;  %v1876_v1 = vpop.xlane.xlu0 %1875 }
 0x3e3   :  { %2820 = vrcp.f32 %v1882_v61 }
 0x3e4   :  { %2822 = vrcp.f32 %v1876_v1 }
 0x3e6   :  { %v1878_v14 = vpop.xlane.xlu1 %1877 }
 0x3e7   :  { %2824 = vrcp.f32 %v1878_v14  ;;  %v1888_v41 = vpop.xlane.xlu0 %1887 }
 0x3e8   :  { %2826 = vrcp.f32 %v1888_v41 }
 0x3e9   :  { %v2819_v28 = vpop.eup %2818 }
 0x3ea   :  { %v2069_v8 = vmul.f32 %v2819_v28, %v3596_v53  ;;  %v1890_v21 = vpop.xlane.xlu1 %1889 }
 0x3eb   :  { %2828 = vrcp.f32 %v1890_v21  ;;  %v1884_v19 = vpop.xlane.xlu0 %1883 }
 0x3ec   :  { %2133 = vst [vmem:[%s4108_s7 + $0x10] sm:$0xff] %v2069_v8  ;;  %2830 = vrcp.f32 %v1884_v19 }
 0x3ed   :  { %v2821_v60 = vpop.eup %2820 }
 0x3ee   :  { %v2823_v9 = vpop.eup %2822  ;;  %v2070_v61 = vmul.f32 %v2821_v60, %v3603_v2  ;;  %v1886_v1 = vpop.xlane.xlu1 %1885 }
 0x3ef   :  { %v2067_v14 = vmul.f32 %v2823_v9, %v3600_v49  ;;  %2832 = vrcp.f32 %v1886_v1  ;;  %v1896_v41 = vpop.xlane.xlu0 %1895 }
 0x3f0   :  { %2134 = vst [vmem:[%s4108_s7 + $0x18] sm:$0xff] %v2070_v61  ;;  %2834 = vrcp.f32 %v1896_v41 }
 0x3f1   :  { %v2825_v53 = vpop.eup %2824  ;;  %2131 = vst [vmem:[%s4108_s7] sm:$0xff] %v2067_v14 }
 0x3f2   :  { %v2827_v19 = vpop.eup %2826  ;;  %v2068_v28 = vmul.f32 %v2825_v53, %v3609_v20  ;;  %v1898_v8 = vpop.xlane.xlu1 %1897 }
 0x3f3   :  { %v2073_v2 = vmul.f32 %v2827_v19, %v3612_v29  ;;  %2836 = vrcp.f32 %v1898_v8  ;;  %v1892_v49 = vpop.xlane.xlu0 %1891 }
 0x3f4   :  { %2132 = vst [vmem:[%s4108_s7 + $0x8] sm:$0xff] %v2068_v28  ;;  %2838 = vrcp.f32 %v1892_v49 }
 0x3f5   :  { %v2829_v9 = vpop.eup %2828  ;;  %2137 = vst [vmem:[%s4108_s7 + $0x30] sm:$0xff] %v2073_v2 }
 0x3f6   :  { %v2831_v21 = vpop.eup %2830  ;;  %v2074_v60 = vmul.f32 %v2829_v9, %v3617_v43  ;;  %v1894_v61 = vpop.xlane.xlu1 %1893 }
 0x3f7   :  { %v2071_v20 = vmul.f32 %v2831_v21, %v3620_v25  ;;  %2840 = vrcp.f32 %v1894_v61  ;;  %v1904_v29 = vpop.xlane.xlu0 %1903 }
 0x3f8   :  { %2138 = vst [vmem:[%s4108_s7 + $0x38] sm:$0xff] %v2074_v60  ;;  %2842 = vrcp.f32 %v1904_v29 }
 0x3f9   :  { %v2833_v1 = vpop.eup %2832  ;;  %2135 = vst [vmem:[%s4108_s7 + $0x20] sm:$0xff] %v2071_v20 }
 0x3fa   :  { %v2835_v14 = vpop.eup %2834  ;;  %v2072_v41 = vmul.f32 %v2833_v1, %v3625_v50  ;;  %v1906_v53 = vpop.xlane.xlu1 %1905 }
 0x3fb   :  { %v2077_v43 = vmul.f32 %v2835_v14, %v3628_v32  ;;  %2844 = vrcp.f32 %v1906_v53  ;;  %v1900_v25 = vpop.xlane.xlu0 %1899 }
 0x3fc   :  { %2136 = vst [vmem:[%s4108_s7 + $0x28] sm:$0xff] %v2072_v41  ;;  %2846 = vrcp.f32 %v1900_v25 }
 0x3fd   :  { %v2837_v19 = vpop.eup %2836  ;;  %2141 = vst [vmem:[%s4108_s7 + $0x50] sm:$0xff] %v2077_v43 }
 0x3fe   :  { %v2839_v28 = vpop.eup %2838  ;;  %v2078_v8 = vmul.f32 %v2837_v19, %v3633_v45  ;;  %v1902_v2 = vpop.xlane.xlu1 %1901 }
 0x3ff   :  { %v2075_v50 = vmul.f32 %v2839_v28, %v3636_v35  ;;  %2848 = vrcp.f32 %v1902_v2  ;;  %v1912_v32 = vpop.xlane.xlu0 %1911 }
 0x400   :  { %2142 = vst [vmem:[%s4108_s7 + $0x58] sm:$0xff] %v2078_v8  ;;  %2850 = vrcp.f32 %v1912_v32 }
 0x401   :  { %v2841_v49 = vpop.eup %2840  ;;  %2139 = vst [vmem:[%s4108_s7 + $0x40] sm:$0xff] %v2075_v50 }
 0x402   :  { %v2843_v9 = vpop.eup %2842  ;;  %v2076_v21 = vmul.f32 %v2841_v49, %v3641_v40  ;;  %v1914_v60 = vpop.xlane.xlu1 %1913 }
 0x403   :  { %v2081_v45 = vmul.f32 %v2843_v9, %v3644_v44  ;;  %2852 = vrcp.f32 %v1914_v60  ;;  %v1908_v35 = vpop.xlane.xlu0 %1907 }
 0x404   :  { %2140 = vst [vmem:[%s4108_s7 + $0x48] sm:$0xff] %v2076_v21  ;;  %2854 = vrcp.f32 %v1908_v35 }
 0x405   :  { %v2845_v61 = vpop.eup %2844  ;;  %2145 = vst [vmem:[%s4108_s7 + $0x70] sm:$0xff] %v2081_v45 }
 0x406   :  { %v2847_v20 = vpop.eup %2846  ;;  %v2082_v29 = vmul.f32 %v2845_v61, %v3649_v46  ;;  %v1910_v1 = vpop.xlane.xlu1 %1909 }
 0x407   :  { %v2079_v40 = vmul.f32 %v2847_v20, %v3652_v48  ;;  %2856 = vrcp.f32 %v1910_v1  ;;  %v1920_v44 = vpop.xlane.xlu0 %1919 }
 0x408   :  { %2146 = vst [vmem:[%s4108_s7 + $0x78] sm:$0xff] %v2082_v29  ;;  %2858 = vrcp.f32 %v1920_v44 }
 0x409   :  { %v2849_v14 = vpop.eup %2848  ;;  %2143 = vst [vmem:[%s4108_s7 + $0x60] sm:$0xff] %v2079_v40 }
 0x40a   :  { %v2851_v41 = vpop.eup %2850  ;;  %v2080_v53 = vmul.f32 %v2849_v14, %v3657_v54  ;;  %v1922_v43 = vpop.xlane.xlu1 %1921 }
 0x40b   :  { %v2085_v46 = vmul.f32 %v2851_v41, %v3660_v63  ;;  %2860 = vrcp.f32 %v1922_v43  ;;  %v1916_v48 = vpop.xlane.xlu0 %1915 }
 0x40c   :  { %2144 = vst [vmem:[%s4108_s7 + $0x68] sm:$0xff] %v2080_v53  ;;  %2862 = vrcp.f32 %v1916_v48 }
 0x40d   :  { %v2853_v25 = vpop.eup %2852  ;;  %2149 = vst [vmem:[%s4108_s7 + $0x90] sm:$0xff] %v2085_v46 }
 0x40e   :  { %v2855_v19 = vpop.eup %2854  ;;  %v2086_v28 = vmul.f32 %v2853_v25, %v3665_v59  ;;  %v1918_v8 = vpop.xlane.xlu1 %1917 }
 0x40f   :  { %v2083_v54 = vmul.f32 %v2855_v19, %v3668_v24  ;;  %2864 = vrcp.f32 %v1918_v8  ;;  %v1928_v63 = vpop.xlane.xlu0 %1927 }
 0x410   :  { %2150 = vst [vmem:[%s4108_s7 + $0x98] sm:$0xff] %v2086_v28  ;;  %2866 = vrcp.f32 %v1928_v63 }
 0x411   :  { %v2857_v2 = vpop.eup %2856  ;;  %2147 = vst [vmem:[%s4108_s7 + $0x80] sm:$0xff] %v2083_v54 }
 0x412   :  { %v2859_v50 = vpop.eup %2858  ;;  %v2084_v32 = vmul.f32 %v2857_v2, %v3673_v62  ;;  %v1930_v49 = vpop.xlane.xlu1 %1929 }
 0x413   :  { %v2089_v59 = vmul.f32 %v2859_v50, %v3676_v30  ;;  %2868 = vrcp.f32 %v1930_v49  ;;  %v1924_v24 = vpop.xlane.xlu0 %1923 }
 0x414   :  { %2148 = vst [vmem:[%s4108_s7 + $0x88] sm:$0xff] %v2084_v32  ;;  %2870 = vrcp.f32 %v1924_v24 }
 0x415   :  { %v2861_v9 = vpop.eup %2860  ;;  %2153 = vst [vmem:[%s4108_s7 + $0xb0] sm:$0xff] %v2089_v59 }
 0x416   :  { %v2863_v21 = vpop.eup %2862  ;;  %v2090_v60 = vmul.f32 %v2861_v9, %v3681_v3  ;;  %v1926_v45 = vpop.xlane.xlu1 %1925 }
 0x417   :  { %v2087_v62 = vmul.f32 %v2863_v21, %v3684_v18  ;;  %2872 = vrcp.f32 %v1926_v45  ;;  %v1936_v30 = vpop.xlane.xlu0 %1935 }
 0x418   :  { %2154 = vst [vmem:[%s4108_s7 + $0xb8] sm:$0xff] %v2090_v60  ;;  %2874 = vrcp.f32 %v1936_v30 }
 0x419   :  { %v2865_v35 = vpop.eup %2864  ;;  %2151 = vst [vmem:[%s4108_s7 + $0xa0] sm:$0xff] %v2087_v62 }
 0x41a   :  { %v2867_v61 = vpop.eup %2866  ;;  %v2088_v20 = vmul.f32 %v2865_v35, %v3689_v6  ;;  %v1938_v29 = vpop.xlane.xlu1 %1937 }
 0x41b   :  { %v2093_v3 = vmul.f32 %v2867_v61, %v3692_v5  ;;  %2876 = vrcp.f32 %v1938_v29  ;;  %v1932_v18 = vpop.xlane.xlu0 %1931 }
 0x41c   :  { %2152 = vst [vmem:[%s4108_s7 + $0xa8] sm:$0xff] %v2088_v20  ;;  %2878 = vrcp.f32 %v1932_v18 }
 0x41d   :  { %v2869_v1 = vpop.eup %2868  ;;  %2157 = vst [vmem:[%s4108_s7 + $0xd0] sm:$0xff] %v2093_v3 }
 0x41e   :  { %v2871_v40 = vpop.eup %2870  ;;  %v2094_v44 = vmul.f32 %v2869_v1, %v3697_v17  ;;  %v1934_v14 = vpop.xlane.xlu1 %1933 }
 0x41f   :  { %v2091_v6 = vmul.f32 %v2871_v40, %v3700_v36  ;;  %2880 = vrcp.f32 %v1934_v14  ;;  %v1944_v5 = vpop.xlane.xlu0 %1943 }
 0x420   :  { %2158 = vst [vmem:[%s4108_s7 + $0xd8] sm:$0xff] %v2094_v44  ;;  %2882 = vrcp.f32 %v1944_v5 }
 0x421   :  { %v2873_v41 = vpop.eup %2872  ;;  %2155 = vst [vmem:[%s4108_s7 + $0xc0] sm:$0xff] %v2091_v6 }
 0x422   :  { %v2875_v53 = vpop.eup %2874  ;;  %v2092_v43 = vmul.f32 %v2873_v41, %v3705_v22  ;;  %v1946_v46 = vpop.xlane.xlu1 %1945 }
 0x423   :  { %v2097_v17 = vmul.f32 %v2875_v53, %v3708_v10  ;;  %2884 = vrcp.f32 %v1946_v46  ;;  %v1940_v36 = vpop.xlane.xlu0 %1939 }
 0x424   :  { %2156 = vst [vmem:[%s4108_s7 + $0xc8] sm:$0xff] %v2092_v43  ;;  %2886 = vrcp.f32 %v1940_v36 }
 0x425   :  { %v2877_v48 = vpop.eup %2876  ;;  %2161 = vst [vmem:[%s4108_s7 + $0xf0] sm:$0xff] %v2097_v17 }
 0x426   :  { %v2879_v25 = vpop.eup %2878  ;;  %v2098_v19 = vmul.f32 %v2877_v48, %v3713_v31  ;;  %v1942_v28 = vpop.xlane.xlu1 %1941 }
 0x427   :  { %v2095_v22 = vmul.f32 %v2879_v25, %v3716_v56  ;;  %2888 = vrcp.f32 %v1942_v28  ;;  %v1952_v10 = vpop.xlane.xlu0 %1951 }
 0x428   :  { %2162 = vst [vmem:[%s4108_s7 + $0xf8] sm:$0xff] %v2098_v19  ;;  %2890 = vrcp.f32 %v1952_v10  ;;  %v4172_v19 = vld [vmem:[#allocation3_spill] sm:$0xff] }
 0x429   :  { %v2881_v8 = vpop.eup %2880  ;;  %2159 = vst [vmem:[%s4108_s7 + $0xe0] sm:$0xff] %v2095_v22 }
 0x42a   :  { %v2883_v54 = vpop.eup %2882  ;;  %v2096_v63 = vmul.f32 %v2881_v8, %v3721_v37  ;;  %v1954_v2 = vpop.xlane.xlu1 %1953 }
 0x42b   :  { %v2101_v31 = vmul.f32 %v2883_v54, %v3724_v27  ;;  %2892 = vrcp.f32 %v1954_v2  ;;  %v1948_v56 = vpop.xlane.xlu0 %1947  ;;  %v4174_v2 = vld [vmem:[#allocation5_spill] sm:$0xff] }
 0x42c   :  { %2160 = vst [vmem:[%s4108_s7 + $0xe8] sm:$0xff] %v2096_v63  ;;  %2894 = vrcp.f32 %v1948_v56 }
 0x42d   :  { %v2885_v50 = vpop.eup %2884  ;;  %2165 = vst [vmem:[%s4108_s7 + $0x110] sm:$0xff] %v2101_v31 }
 0x42e   :  { %v2887_v32 = vpop.eup %2886  ;;  %v2102_v49 = vmul.f32 %v2885_v50, %v3729_v42  ;;  %v1950_v59 = vpop.xlane.xlu1 %1949  ;;  %v4175_v50 = vld [vmem:[#allocation6_spill] sm:$0xff] }
 0x42f   :  { %v2099_v37 = vmul.f32 %v2887_v32, %v3732_v33  ;;  %2896 = vrcp.f32 %v1950_v59  ;;  %v1960_v27 = vpop.xlane.xlu0 %1959 }
 0x430   :  { %2166 = vst [vmem:[%s4108_s7 + $0x118] sm:$0xff] %v2102_v49  ;;  %2898 = vrcp.f32 %v1960_v27  ;;  %v4176_v27 = vld [vmem:[#allocation7_spill] sm:$0xff] }
 0x431   :  { %v2889_v24 = vpop.eup %2888  ;;  %2163 = vst [vmem:[%s4108_s7 + $0x100] sm:$0xff] %v2099_v37 }
 0x432   :  { %v2891_v9 = vpop.eup %2890  ;;  %v2100_v21 = vmul.f32 %v2889_v24, %v3737_v7  ;;  %v1962_v60 = vpop.xlane.xlu1 %1961 }
 0x433   :  { %v2105_v42 = vmul.f32 %v2891_v9, %v3740_v38  ;;  %2900 = vrcp.f32 %v1962_v60  ;;  %v1956_v33 = vpop.xlane.xlu0 %1955 }
 0x434   :  { %2164 = vst [vmem:[%s4108_s7 + $0x108] sm:$0xff] %v2100_v21  ;;  %2902 = vrcp.f32 %v1956_v33  ;;  %v4177_v21 = vld [vmem:[#allocation8_spill] sm:$0xff] }
 0x435   :  { %v2893_v45 = vpop.eup %2892  ;;  %2169 = vst [vmem:[%s4108_s7 + $0x130] sm:$0xff] %v2105_v42 }
 0x436   :  { %v2895_v62 = vpop.eup %2894  ;;  %v2106_v30 = vmul.f32 %v2893_v45, %v3745_v58  ;;  %v1958_v35 = vpop.xlane.xlu1 %1957 }
 0x437   :  { %v2103_v7 = vmul.f32 %v2895_v62, %v3748_v23  ;;  %2904 = vrcp.f32 %v1958_v35  ;;  %v1968_v38 = vpop.xlane.xlu0 %1967  ;;  %v4178_v35 = vld [vmem:[#allocation9_spill] sm:$0xff] }
 0x438   :  { %2170 = vst [vmem:[%s4108_s7 + $0x138] sm:$0xff] %v2106_v30  ;;  %2906 = vrcp.f32 %v1968_v38 }
 0x439   :  { %v2897_v61 = vpop.eup %2896  ;;  %2167 = vst [vmem:[%s4108_s7 + $0x120] sm:$0xff] %v2103_v7 }
 0x43a   :  { %v2899_v20 = vpop.eup %2898  ;;  %v2104_v29 = vmul.f32 %v2897_v61, %v3753_v0  ;;  %v1970_v3 = vpop.xlane.xlu1 %1969 }
 0x43b   :  { %v2109_v58 = vmul.f32 %v2899_v20, %v3756_v39  ;;  %2908 = vrcp.f32 %v1970_v3  ;;  %v1964_v23 = vpop.xlane.xlu0 %1963 }
 0x43c   :  { %2168 = vst [vmem:[%s4108_s7 + $0x128] sm:$0xff] %v2104_v29  ;;  %2910 = vrcp.f32 %v1964_v23 }
 0x43d   :  { %v2901_v18 = vpop.eup %2900  ;;  %2173 = vst [vmem:[%s4108_s7 + $0x150] sm:$0xff] %v2109_v58 }
 0x43e   :  { %v2903_v1 = vpop.eup %2902  ;;  %v2110_v40 = vmul.f32 %v2901_v18, %v3761_v16  ;;  %v1966_v44 = vpop.xlane.xlu1 %1965 }
 0x43f   :  { %v2107_v0 = vmul.f32 %v2903_v1, %v3764_v12  ;;  %2912 = vrcp.f32 %v1966_v44  ;;  %v1976_v39 = vpop.xlane.xlu0 %1975 }
 0x440   :  { %2174 = vst [vmem:[%s4108_s7 + $0x158] sm:$0xff] %v2110_v40  ;;  %2914 = vrcp.f32 %v1976_v39  ;;  %v4179_v39 = vld [vmem:[#allocation10_spill] sm:$0xff] }
 0x441   :  { %v2905_v14 = vpop.eup %2904  ;;  %2171 = vst [vmem:[%s4108_s7 + $0x140] sm:$0xff] %v2107_v0 }
 0x442   :  { %v2907_v6 = vpop.eup %2906  ;;  %v2108_v5 = vmul.f32 %v2905_v14, %v3769_v26  ;;  %v1978_v41 = vpop.xlane.xlu1 %1977  ;;  %v4171_v26 = vld [vmem:[#allocation2_spill] sm:$0xff] }
 0x443   :  { %v2113_v16 = vmul.f32 %v2907_v6, %v3772_v51  ;;  %2916 = vrcp.f32 %v1978_v41  ;;  %v1972_v12 = vpop.xlane.xlu0 %1971  ;;  %v4180_v41 = vld [vmem:[#allocation11_spill] sm:$0xff] }
 0x444   :  { %2172 = vst [vmem:[%s4108_s7 + $0x148] sm:$0xff] %v2108_v5  ;;  %2918 = vrcp.f32 %v1972_v12 }
 0x445   :  { %v2909_v53 = vpop.eup %2908  ;;  %2177 = vst [vmem:[%s4108_s7 + $0x170] sm:$0xff] %v2113_v16 }
 0x446   :  { %v2911_v43 = vpop.eup %2910  ;;  %v2114_v46 = vmul.f32 %v2909_v53, %v3777_v13  ;;  %v1974_v17 = vpop.xlane.xlu1 %1973  ;;  %v4173_v13 = vld [vmem:[#allocation4_spill] sm:$0xff] }
 0x447   :  { %v2111_v36 = vmul.f32 %v2911_v43, %v4171_v26  ;;  %2920 = vrcp.f32 %v1974_v17  ;;  %v1984_v51 = vpop.xlane.xlu0 %1983 }
 0x448   :  { %2178 = vst [vmem:[%s4108_s7 + $0x178] sm:$0xff] %v2114_v46  ;;  %2922 = vrcp.f32 %v1984_v51 }
 0x449   :  { %v2913_v48 = vpop.eup %2912  ;;  %2175 = vst [vmem:[%s4108_s7 + $0x160] sm:$0xff] %v2111_v36 }
 0x44a   :  { %v2915_v25 = vpop.eup %2914  ;;  %v2112_v28 = vmul.f32 %v2913_v48, %v4172_v19  ;;  %v1986_v22 = vpop.xlane.xlu1 %1985 }
 0x44b   :  { %v2117_v10 = vmul.f32 %v2915_v25, %v4173_v13  ;;  %2924 = vrcp.f32 %v1986_v22  ;;  %v1980_v8 = vpop.xlane.xlu0 %1979 }
 0x44c   :  { %2176 = vst [vmem:[%s4108_s7 + $0x168] sm:$0xff] %v2112_v28  ;;  %2926 = vrcp.f32 %v1980_v8 }
 0x44d   :  { %v2917_v54 = vpop.eup %2916  ;;  %2181 = vst [vmem:[%s4108_s7 + $0x190] sm:$0xff] %v2117_v10 }
 0x44e   :  { %v2919_v63 = vpop.eup %2918  ;;  %v2118_v31 = vmul.f32 %v2917_v54, %v4174_v2  ;;  %v1982_v56 = vpop.xlane.xlu1 %1981 }
 0x44f   :  { %v2115_v32 = vmul.f32 %v2919_v63, %v4175_v50  ;;  %2928 = vrcp.f32 %v1982_v56  ;;  %v1992_v49 = vpop.xlane.xlu0 %1991 }
 0x450   :  { %2182 = vst [vmem:[%s4108_s7 + $0x198] sm:$0xff] %v2118_v31  ;;  %2930 = vrcp.f32 %v1992_v49 }
 0x451   :  { %v2921_v59 = vpop.eup %2920  ;;  %2179 = vst [vmem:[%s4108_s7 + $0x180] sm:$0xff] %v2115_v32 }
 0x452   :  { %v2923_v37 = vpop.eup %2922  ;;  %v2116_v24 = vmul.f32 %v2921_v59, %v4176_v27  ;;  %v1994_v9 = vpop.xlane.xlu1 %1993 }
 0x453   :  { %v2121_v60 = vmul.f32 %v2923_v37, %v4177_v21  ;;  %2932 = vrcp.f32 %v1994_v9  ;;  %v1988_v42 = vpop.xlane.xlu0 %1987 }
 0x454   :  { %2180 = vst [vmem:[%s4108_s7 + $0x188] sm:$0xff] %v2116_v24  ;;  %2934 = vrcp.f32 %v1988_v42 }
 0x455   :  { %v2925_v33 = vpop.eup %2924  ;;  %2185 = vst [vmem:[%s4108_s7 + $0x1b0] sm:$0xff] %v2121_v60 }
 0x456   :  { %v2927_v45 = vpop.eup %2926  ;;  %v2122_v62 = vmul.f32 %v2925_v33, %v3808_v55  ;;  %v1990_v30 = vpop.xlane.xlu1 %1989 }
 0x457   :  { %v2119_v7 = vmul.f32 %v2927_v45, %v4178_v35  ;;  %2936 = vrcp.f32 %v1990_v30 }
 0x458   :  { %2186 = vst [vmem:[%s4108_s7 + $0x1b8] sm:$0xff] %v2122_v62 }
 0x459   :  { %v2929_v38 = vpop.eup %2928  ;;  %2183 = vst [vmem:[%s4108_s7 + $0x1a0] sm:$0xff] %v2119_v7 }
 0x45a   :  { %v2931_v61 = vpop.eup %2930  ;;  %v2120_v20 = vmul.f32 %v2929_v38, %v3816_v15 }
 0x45b   :  { %v2125_v29 = vmul.f32 %v2931_v61, %v3820_v4  ;;  %v1996_v3 = vpop.xlane.xlu0 %1995 }
 0x45c   :  { %2184 = vst [vmem:[%s4108_s7 + $0x1a8] sm:$0xff] %v2120_v20  ;;  %2938 = vrcp.f32 %v1996_v3  ;;  %v1998_v55 = vpop.xlane.xlu1 %1997 }
 0x45d   :  { %v2933_v58 = vpop.eup %2932  ;;  %2189 = vst [vmem:[%s4108_s7 + $0x1d0] sm:$0xff] %v2125_v29  ;;  %2940 = vrcp.f32 %v1998_v55 }
 0x45e   :  { %v2935_v23 = vpop.eup %2934  ;;  %v2126_v18 = vmul.f32 %v2933_v58, %v3824_v52 }
 0x45f   :  { %v2123_v15 = vmul.f32 %v2935_v23, %v3826_v47  ;;  %v2000_v1 = vpop.xlane.xlu0 %1999 }
 0x460   :  { %2190 = vst [vmem:[%s4108_s7 + $0x1d8] sm:$0xff] %v2126_v18  ;;  %2942 = vrcp.f32 %v2000_v1  ;;  %v2002_v4 = vpop.xlane.xlu1 %2001 }
 0x461   :  { %v2937_v40 = vpop.eup %2936  ;;  %2187 = vst [vmem:[%s4108_s7 + $0x1c0] sm:$0xff] %v2123_v15  ;;  %2944 = vrcp.f32 %v2002_v4 }
 0x462   :  { %v2124_v44 = vmul.f32 %v2937_v40, %v3830_v11 }
 0x464   :  { %2188 = vst [vmem:[%s4108_s7 + $0x1c8] sm:$0xff] %v2124_v44 }
 0x466   :  { %v2939_v52 = vpop.eup %2938 }
 0x467   :  { %v2941_v47 = vpop.eup %2940  ;;  %v2127_v0 = vmul.f32 %v2939_v52, %v3833_v34 }
 0x468   :  { %v2128_v14 = vmul.f32 %v2941_v47, %v4179_v39 }
 0x469   :  { %2191 = vst [vmem:[%s4108_s7 + $0x1e0] sm:$0xff] %v2127_v0 }
 0x46a   :  { %v2943_v6 = vpop.eup %2942  ;;  %2192 = vst [vmem:[%s4108_s7 + $0x1e8] sm:$0xff] %v2128_v14 }
 0x46b   :  { %v2945_v11 = vpop.eup %2944  ;;  %v2129_v5 = vmul.f32 %v2943_v6, %v3839_v57 }
 0x46c   :  { %v2130_v16 = vmul.f32 %v2945_v11, %v4180_v41 }
 0x46d   :  { %2193 = vst [vmem:[%s4108_s7 + $0x1f0] sm:$0xff] %v2129_v5 }
 0x46e   :  { %2194 = vst [vmem:[%s4108_s7 + $0x1f8] sm:$0xff] %v2130_v16 }

</bundles_post_ra>
